<compile_context>
chip_gen: v7x
topology: tpu7x:2x2x1
jax: 0.10.0
libtpu: 0.0.40
codegen_flags: <defaults>
</compile_context>

<pallas_src>
import numpy as np
import jax
import jax.numpy as jnp
from jax import lax
from jax.experimental import pallas as pl
from jax.experimental.pallas import tpu as pltpu

N_CONV_LAYERS = 5
_LAYER_STRIDES = (2, 1, 2, 1, 2)       # matches the PyTorch CNNEncoder stack


# ---------------------------------------------------------------------------
# exact (erf-based) GELU matching torch.nn.GELU() default.  erf via the
# A&S 7.1.26 rational approximation (|err| < 1.5e-7 -- well inside the 5e-3
# validation tolerance).  The divide goes to the EUP via approx reciprocal.
# ---------------------------------------------------------------------------
def _erf(x):
    a1, a2, a3, a4, a5 = (0.254829592, -0.284496736, 1.421413741,
                          -1.453152027, 1.061405429)
    p = 0.3275911
    sgn = jnp.where(x >= 0.0, 1.0, -1.0)
    ax = jnp.abs(x)
    t = pl.reciprocal(1.0 + p * ax, approx=True)      # EUP slot, not VALU divide
    poly = ((((a5 * t + a4) * t + a3) * t + a2) * t + a1) * t
    return sgn * (1.0 - poly * jnp.exp(-ax * ax))


def _gelu(x):
    return 0.5 * x * (1.0 + _erf(x * 0.7071067811865476))


# ---------------------------------------------------------------------------
# Fused per-image encoder kernel (one grid program per image).
#
# ref order:
#   refs[0]                       x      [1, H0, W0*C0]
#   per conv layer l (in order):
#     stride-2:  R_l [3*Hout, Hin] (0/1 selector), Wp_l [3*Win*Cin, Wout*Cout],
#                b_l [1, Wout*Cout]
#     stride-1:  Wp_l, b_l                      (row shifts done with slices)
#   refs[-3], refs[-2]            Wh [256, 2z] (mean||log_std), bh [1, 2z]
#   refs[-1]                      out [1, 1, 2z]
# ---------------------------------------------------------------------------
def _encoder_kernel(*refs):
    x = refs[0][0]                                   # [H, W*C] for this image
    idx = 1
    for s in _LAYER_STRIDES:
        if s == 2:
            r_ref, w_ref, b_ref = refs[idx], refs[idx + 1], refs[idx + 2]
            idx += 3
            h_out = r_ref.shape[0] // 3
            # Row selection FIRST (drops stride-discarded rows before the big
            # channel-mix dot); all 3 taps' selectors folded into one dot.
            sel = jnp.dot(r_ref[...], x, preferred_element_type=jnp.float32)
            parts = [sel[kh * h_out:(kh + 1) * h_out, :] for kh in range(3)]
        else:
            w_ref, b_ref = refs[idx], refs[idx + 1]
            idx += 2
            # stride-1: +/-1 row shift with zero border (sublane slices; no
            # selector matmul at all).
            zrow = jnp.zeros((1, x.shape[1]), jnp.float32)
            p0 = jnp.concatenate([zrow, x[:-1, :]], axis=0)   # row oh -> x[oh-1]
            p2 = jnp.concatenate([x[1:, :], zrow], axis=0)    # row oh -> x[oh+1]
            parts = [p0, x, p2]
        # Fold the 3 taps into ONE wide-K dot: [H_out, 3*Win*Cin] @ packed W.
        lhs = jnp.concatenate(parts, axis=1)
        y = jnp.dot(lhs, w_ref[...], preferred_element_type=jnp.float32)
        x = _gelu(y + b_ref[...])

    wh_ref, bh_ref, out_ref = refs[idx], refs[idx + 1], refs[idx + 2]
    # Lane-flatten [H_last, W_last*C_last] -> [1, H*W*C]; the PyTorch (c,h,w)
    # flatten order is folded into wh on the host.  ONE head dot producing
    # mean||log_std, one lane-dense store.
    flat = jnp.concatenate([x[oh:oh + 1, :] for oh in range(x.shape[0])], axis=1)
    out = jnp.dot(flat, wh_ref[...], preferred_element_type=jnp.float32) + bh_ref[...]
    out_ref[...] = out[None]                         # [1, 1, 2z]


# ---------------------------------------------------------------------------
# Host-side wrapper: one layout op on the input, then one pallas_call.
# ---------------------------------------------------------------------------
def cnn_encoder_forward(x_nchw, ops):
    """x_nchw: [B, C, H, W] images in [0, 1].  Returns (mean, log_std)."""
    B, C, H, W = x_nchw.shape
    # single input re-layout: NCHW -> per-image lane-dense [H, W*C]
    x3d = jnp.transpose(x_nchw, (0, 2, 3, 1)).reshape(B, H, W * C)
    z2 = ops["head_w"].shape[1]

    operands = [x3d]
    in_specs = [pl.BlockSpec((1, H, W * C), lambda b: (b, 0, 0))]

    def _shared(arr):                 # weight slab: same block for every image
        operands.append(arr)
        in_specs.append(pl.BlockSpec(arr.shape, lambda b: (0, 0)))

    # Advisory cost estimate (this kernel is latency / per-dot-overhead bound,
    # far below any HBM/VMEM limit -- no pipelining knobs needed at this size).
    flops, trans = 0, 0
    h = H
    for l, s in enumerate(_LAYER_STRIDES):
        wp, bias = ops[f"w{l}"], ops[f"b{l}"]
        h_out = (h - 1) // s + 1
        if s == 2:
            r = ops[f"r{l}"]
            _shared(r)
            flops += 2 * B * r.shape[0] * r.shape[1] * (wp.shape[0] // 3)
        _shared(wp)
        _shared(bias)
        flops += 2 * B * h_out * wp.shape[0] * wp.shape[1]
        trans += 2 * B * h_out * wp.shape[1]          # exp + rcp per GELU elem
        h = h_out
    _shared(ops["head_w"])
    _shared(ops["head_b"])
    flops += 2 * B * ops["head_w"].shape[0] * ops["head_w"].shape[1]
    bytes_accessed = 4 * (sum(int(np.prod(a.shape)) for a in operands) + B * z2)

    out = pl.pallas_call(
        _encoder_kernel,
        grid=(B,),                                    # one image per program
        in_specs=in_specs,
        out_specs=pl.BlockSpec((1, 1, z2), lambda b: (b, 0, 0)),
        out_shape=jax.ShapeDtypeStruct((B, 1, z2), jnp.float32),
        compiler_params=pltpu.CompilerParams(
            dimension_semantics=("parallel",)),       # use both TCs on v7x
        cost_estimate=pl.CostEstimate(
            flops=int(flops), transcendentals=int(trans),
            bytes_accessed=int(bytes_accessed)),
    )(*operands)

    out = out.reshape(B, z2)
    z = z2 // 2
    return out[:, :z], out[:, z:]


# ---------------------------------------------------------------------------
# Layer definitions (PyTorch CNNEncoder):
#   Conv2d(Cin, c,  k3, p1, s2), GELU
#   Conv2d(c,   c,  k3, p1, s1), GELU
#   Conv2d(c,  2c,  k3, p1, s2), GELU
#   Conv2d(2c, 2c,  k3, p1, s1), GELU
#   Conv2d(2c, 2c,  k3, p1, s2), GELU, Flatten
#   mean / log_std = Linear(2*16*c, z)
# ---------------------------------------------------------------------------
def _layer_defs(num_input_channels, c_hid):
    c = c_hid
    return [("c1", num_input_channels, c, 2),
            ("c2", c, c, 1),
            ("c3", c, 2 * c, 2),
            ("c4", 2 * c, 2 * c, 1),
            ("c5", 2 * c, 2 * c, 2)]


# ---------------------------------------------------------------------------
# Host-side (init-time) re-layout of PyTorch-layout params into per-image
# selector matrices and tap-packed channel-mixing slabs.  Everything here is
# independent of the batch size (selectors are per-image now).
# ---------------------------------------------------------------------------
def prepare_operands(params, *, height, width, num_input_channels, c_hid, z_dim):
    layer_defs = _layer_defs(num_input_channels, c_hid)
    ops = {}
    h_in, w_in = height, width
    for l, (name, cin, cout, s) in enumerate(layer_defs):
        h_out = (h_in - 1) // s + 1          # floor((H + 2 - 3)/s) + 1
        w_out = (w_in - 1) // s + 1
        w_pt = np.asarray(params[f"{name}_w"], np.float32)   # [cout, cin, 3, 3]
        b_pt = np.asarray(params[f"{name}_b"], np.float32)   # [cout]

        # Packed channel-mix + W-tap selection (absorbs stride + W padding);
        # K is laid out as [kh, wi, cin] to match the lane-concatenated LHS.
        Wp = np.zeros((3, w_in * cin, w_out * cout), np.float32)
        for kh in range(3):
            for kw in range(3):
                tap = w_pt[:, :, kh, kw].T                    # [cin, cout]
                for ow in range(w_out):
                    wi = s * ow + kw - 1
                    if 0 <= wi < w_in:
                        Wp[kh, wi * cin:(wi + 1) * cin,
                               ow * cout:(ow + 1) * cout] = tap
        ops[f"w{l}"] = jnp.asarray(Wp.reshape(3 * w_in * cin, w_out * cout))
        ops[f"b{l}"] = jnp.asarray(
            np.tile(b_pt, w_out).reshape(1, w_out * cout).astype(np.float32))

        if s == 2:
            # Per-image 0/1 row selector (absorbs stride + H zero-padding);
            # all 3 taps stacked so the kernel needs ONE selector dot.
            R = np.zeros((3 * h_out, h_in), np.float32)
            for kh in range(3):
                for oh in range(h_out):
                    hh = s * oh + kh - 1
                    if 0 <= hh < h_in:
                        R[kh * h_out + oh, hh] = 1.0
            ops[f"r{l}"] = jnp.asarray(R)
        h_in, w_in = h_out, w_out

    # Head: mean||log_std concatenated along N, PyTorch NCHW flatten order
    # (c, h, w) folded into the K permutation of one [H*W*C, 2z] slab.
    c_last = layer_defs[-1][2]
    h_last, w_last = h_in, w_in
    mean_w = np.asarray(params["mean_w"], np.float32)         # [z, c*h*w]
    logstd_w = np.asarray(params["logstd_w"], np.float32)
    z = z_dim
    Wh = np.zeros((h_last * w_last * c_last, 2 * z), np.float32)
    for oh in range(h_last):
        for ow in range(w_last):
            for co in range(c_last):
                f = co * h_last * w_last + oh * w_last + ow
                k = oh * (w_last * c_last) + ow * c_last + co
                Wh[k, :z] = mean_w[:, f]
                Wh[k, z:] = logstd_w[:, f]
    ops["head_w"] = jnp.asarray(Wh)
    ops["head_b"] = jnp.asarray(np.concatenate(
        [np.asarray(params["mean_b"], np.float32),
         np.asarray(params["logstd_b"], np.float32)]).reshape(1, 2 * z))
    return ops


# ---------------------------------------------------------------------------
# Deterministic synthetic parameter init (PyTorch tensor layouts).
# ---------------------------------------------------------------------------
def init_params(key, *, num_input_channels, c_hid, z_dim):
    layer_defs = _layer_defs(num_input_channels, c_hid)
    ks = jax.random.split(key, 2 * len(layer_defs) + 4)

    def rnd(k, shape, fan_in):
        return jax.random.normal(k, shape, jnp.float32) / jnp.sqrt(float(fan_in))

    params = {}
    i = 0
    for name, cin, cout, _s in layer_defs:
        params[f"{name}_w"] = rnd(ks[i], (cout, cin, 3, 3), cin * 9); i += 1
        params[f"{name}_b"] = rnd(ks[i], (cout,), cin * 9); i += 1
    feat = 2 * 16 * c_hid
    params["mean_w"] = rnd(ks[i], (z_dim, feat), feat); i += 1
    params["mean_b"] = rnd(ks[i], (z_dim,), feat); i += 1
    params["logstd_w"] = rnd(ks[i], (z_dim, feat), feat); i += 1
    params["logstd_b"] = rnd(ks[i], (z_dim,), feat); i += 1
    return params


# ---------------------------------------------------------------------------
# Pure-JAX (XLA) reference for validation.
# ---------------------------------------------------------------------------
def reference_forward(x, params, *, num_input_channels, c_hid):
    g = lambda t: jax.nn.gelu(t, approximate=False)

    def conv(h, w, b, s):
        y = lax.conv_general_dilated(
            h, w, window_strides=(s, s), padding=[(1, 1), (1, 1)],
            dimension_numbers=("NCHW", "OIHW", "NCHW"))
        return y + b[None, :, None, None]

    h = x
    for name, _cin, _cout, s in _layer_defs(num_input_channels, c_hid):
        h = g(conv(h, params[f"{name}_w"], params[f"{name}_b"], s))
    hf = h.reshape(h.shape[0], -1)                         # NCHW flatten
    mean = hf @ params["mean_w"].T + params["mean_b"]
    log_std = hf @ params["logstd_w"].T + params["logstd_b"]
    return mean, log_std


if __name__ == "__main__":
    B, n_ch, c_hid, z_dim = 2, 1, 8, 20
    H = W = 28                           # MNIST-sized (28 -> 14 -> 7 -> 4)

    key = jax.random.PRNGKey(0)
    kp, kx = jax.random.split(key)
    params = init_params(kp, num_input_channels=n_ch, c_hid=c_hid, z_dim=z_dim)
    x = jax.random.uniform(kx, (B, n_ch, H, W), jnp.float32)   # images in [0,1)

    ops = prepare_operands(params, height=H, width=W,
                           num_input_channels=n_ch, c_hid=c_hid, z_dim=z_dim)

    fwd = jax.jit(cnn_encoder_forward)
    mean, log_std = jax.block_until_ready(fwd(x, ops))

    assert mean.shape == (B, z_dim), mean.shape
    assert log_std.shape == (B, z_dim), log_std.shape
    assert bool(jnp.all(jnp.isfinite(mean))) and bool(jnp.all(jnp.isfinite(log_std)))

    ref_mean, ref_log_std = reference_forward(
        x, params, num_input_channels=n_ch, c_hid=c_hid)
    max_err = max(float(jnp.max(jnp.abs(mean - ref_mean))),
                  float(jnp.max(jnp.abs(log_std - ref_log_std))))
    assert jnp.allclose(mean, ref_mean, atol=5e-3, rtol=5e-3), max_err
    assert jnp.allclose(log_std, ref_log_std, atol=5e-3, rtol=5e-3), max_err

    print("KERNEL_OK")
</pallas_src>

<mosaic_0001>
module attributes {stable_mosaic.version = 11 : i64} {
  func.func @_encoder_kernel(%arg0: i32, %arg1: memref<1x28x28xf32, #tpu.memory_space<vmem>>, %arg2: memref<42x28xf32, #tpu.memory_space<vmem>>, %arg3: memref<84x112xf32, #tpu.memory_space<vmem>>, %arg4: memref<1x112xf32, #tpu.memory_space<vmem>>, %arg5: memref<336x112xf32, #tpu.memory_space<vmem>>, %arg6: memref<1x112xf32, #tpu.memory_space<vmem>>, %arg7: memref<21x14xf32, #tpu.memory_space<vmem>>, %arg8: memref<336x112xf32, #tpu.memory_space<vmem>>, %arg9: memref<1x112xf32, #tpu.memory_space<vmem>>, %arg10: memref<336x112xf32, #tpu.memory_space<vmem>>, %arg11: memref<1x112xf32, #tpu.memory_space<vmem>>, %arg12: memref<12x7xf32, #tpu.memory_space<vmem>>, %arg13: memref<336x64xf32, #tpu.memory_space<vmem>>, %arg14: memref<1x64xf32, #tpu.memory_space<vmem>>, %arg15: memref<256x40xf32, #tpu.memory_space<vmem>>, %arg16: memref<1x40xf32, #tpu.memory_space<vmem>>, %arg17: memref<1x1x40xf32, #tpu.memory_space<vmem>>) attributes {dimension_semantics = [#tpu.dimension_semantics<parallel>], iteration_bounds = array<i64: 2>, scalar_prefetch = 0 : i64, scratch_operands = 0 : i64, tpu.core_type = #tpu.core_type<tc>, window_params = [{transform_indices = @transform_0, window_bounds = array<i64: 1, 28, 28>}, {pipeline_mode = #tpu.pipeline_mode<synchronous>, transform_indices = @transform_1, window_bounds = array<i64: 42, 28>}, {pipeline_mode = #tpu.pipeline_mode<synchronous>, transform_indices = @transform_2, window_bounds = array<i64: 84, 112>}, {pipeline_mode = #tpu.pipeline_mode<synchronous>, transform_indices = @transform_3, window_bounds = array<i64: 1, 112>}, {pipeline_mode = #tpu.pipeline_mode<synchronous>, transform_indices = @transform_4, window_bounds = array<i64: 336, 112>}, {pipeline_mode = #tpu.pipeline_mode<synchronous>, transform_indices = @transform_5, window_bounds = array<i64: 1, 112>}, {pipeline_mode = #tpu.pipeline_mode<synchronous>, transform_indices = @transform_6, window_bounds = array<i64: 21, 14>}, {pipeline_mode = #tpu.pipeline_mode<synchronous>, transform_indices = @transform_7, window_bounds = array<i64: 336, 112>}, {pipeline_mode = #tpu.pipeline_mode<synchronous>, transform_indices = @transform_8, window_bounds = array<i64: 1, 112>}, {pipeline_mode = #tpu.pipeline_mode<synchronous>, transform_indices = @transform_9, window_bounds = array<i64: 336, 112>}, {pipeline_mode = #tpu.pipeline_mode<synchronous>, transform_indices = @transform_10, window_bounds = array<i64: 1, 112>}, {pipeline_mode = #tpu.pipeline_mode<synchronous>, transform_indices = @transform_11, window_bounds = array<i64: 12, 7>}, {pipeline_mode = #tpu.pipeline_mode<synchronous>, transform_indices = @transform_12, window_bounds = array<i64: 336, 64>}, {pipeline_mode = #tpu.pipeline_mode<synchronous>, transform_indices = @transform_13, window_bounds = array<i64: 1, 64>}, {pipeline_mode = #tpu.pipeline_mode<synchronous>, transform_indices = @transform_14, window_bounds = array<i64: 256, 40>}, {pipeline_mode = #tpu.pipeline_mode<synchronous>, transform_indices = @transform_15, window_bounds = array<i64: 1, 40>}, {transform_indices = @transform_16, window_bounds = array<i64: 1, 1, 40>}]} {
    %c0 = arith.constant 0 : index
    %c0_0 = arith.constant 0 : index
    %c0_1 = arith.constant 0 : index
    %0 = vector.load %arg1[%c0, %c0_0, %c0_1] : memref<1x28x28xf32, #tpu.memory_space<vmem>>, vector<1x28x28xf32>
    %1 = vector.shape_cast %0 : vector<1x28x28xf32> to vector<28x28xf32>
    %c0_2 = arith.constant 0 : index
    %c0_3 = arith.constant 0 : index
    %2 = vector.load %arg2[%c0_2, %c0_3] : memref<42x28xf32, #tpu.memory_space<vmem>>, vector<42x28xf32>
    %cst = arith.constant dense<0.000000e+00> : vector<42x28xf32>
    %3 = tpu.matmul %2, %1, %cst {dimension_numbers = #tpu.dot_dimension_numbers<[1], [0], [0], [1], [0, 0, 1, 1], [], []>} : vector<42x28xf32>, vector<28x28xf32>, vector<42x28xf32> -> vector<42x28xf32>
    %4 = vector.extract_strided_slice %3 {offsets = [0, 0], sizes = [14, 28], strides = [1, 1]} : vector<42x28xf32> to vector<14x28xf32>
    %5 = vector.extract_strided_slice %3 {offsets = [14, 0], sizes = [14, 28], strides = [1, 1]} : vector<42x28xf32> to vector<14x28xf32>
    %6 = vector.extract_strided_slice %3 {offsets = [28, 0], sizes = [14, 28], strides = [1, 1]} : vector<42x28xf32> to vector<14x28xf32>
    %7 = tpu.concatenate %4, %5, %6 in 1 : vector<14x28xf32>, vector<14x28xf32>, vector<14x28xf32> -> vector<14x84xf32>
    %c0_4 = arith.constant 0 : index
    %c0_5 = arith.constant 0 : index
    %8 = vector.load %arg3[%c0_4, %c0_5] : memref<84x112xf32, #tpu.memory_space<vmem>>, vector<84x112xf32>
    %cst_6 = arith.constant dense<0.000000e+00> : vector<14x112xf32>
    %9 = tpu.matmul %7, %8, %cst_6 {dimension_numbers = #tpu.dot_dimension_numbers<[1], [0], [0], [1], [0, 0, 1, 1], [], []>} : vector<14x84xf32>, vector<84x112xf32>, vector<14x112xf32> -> vector<14x112xf32>
    %c0_7 = arith.constant 0 : index
    %c0_8 = arith.constant 0 : index
    %10 = vector.load %arg4[%c0_7, %c0_8] : memref<1x112xf32, #tpu.memory_space<vmem>>, vector<1x112xf32>
    %11 = vector.broadcast %10 : vector<1x112xf32> to vector<14x112xf32>
    %12 = arith.addf %9, %11 : vector<14x112xf32>
    %cst_9 = arith.constant 5.000000e-01 : f32
    %13 = vector.broadcast %cst_9 : f32 to vector<14x112xf32>
    %14 = arith.mulf %13, %12 : vector<14x112xf32>
    %cst_10 = arith.constant 0.707106769 : f32
    %15 = vector.broadcast %cst_10 : f32 to vector<14x112xf32>
    %16 = arith.mulf %12, %15 : vector<14x112xf32>
    %cst_11 = arith.constant 0.000000e+00 : f32
    %17 = vector.broadcast %cst_11 : f32 to vector<14x112xf32>
    %18 = arith.cmpf oge, %16, %17 : vector<14x112xf32>
    %cst_12 = arith.constant 1.000000e+00 : f32
    %cst_13 = arith.constant -1.000000e+00 : f32
    %19 = vector.broadcast %cst_12 : f32 to vector<14x112xf32>
    %20 = vector.broadcast %cst_13 : f32 to vector<14x112xf32>
    %21 = arith.select %18, %19, %20 : vector<14x112xi1>, vector<14x112xf32>
    %22 = math.absf %16 : vector<14x112xf32>
    %cst_14 = arith.constant 0.327591091 : f32
    %23 = vector.broadcast %cst_14 : f32 to vector<14x112xf32>
    %24 = arith.mulf %23, %22 : vector<14x112xf32>
    %cst_15 = arith.constant 1.000000e+00 : f32
    %25 = vector.broadcast %cst_15 : f32 to vector<14x112xf32>
    %26 = arith.addf %25, %24 : vector<14x112xf32>
    %27 = tpu.reciprocal %26 {approx = true} : vector<14x112xf32> -> vector<14x112xf32>
    %cst_16 = arith.constant 1.06140542 : f32
    %28 = vector.broadcast %cst_16 : f32 to vector<14x112xf32>
    %29 = arith.mulf %28, %27 : vector<14x112xf32>
    %cst_17 = arith.constant -1.45315206 : f32
    %30 = vector.broadcast %cst_17 : f32 to vector<14x112xf32>
    %31 = arith.addf %29, %30 : vector<14x112xf32>
    %32 = arith.mulf %31, %27 : vector<14x112xf32>
    %cst_18 = arith.constant 1.42141378 : f32
    %33 = vector.broadcast %cst_18 : f32 to vector<14x112xf32>
    %34 = arith.addf %32, %33 : vector<14x112xf32>
    %35 = arith.mulf %34, %27 : vector<14x112xf32>
    %cst_19 = arith.constant -0.284496725 : f32
    %36 = vector.broadcast %cst_19 : f32 to vector<14x112xf32>
    %37 = arith.addf %35, %36 : vector<14x112xf32>
    %38 = arith.mulf %37, %27 : vector<14x112xf32>
    %cst_20 = arith.constant 0.254829586 : f32
    %39 = vector.broadcast %cst_20 : f32 to vector<14x112xf32>
    %40 = arith.addf %38, %39 : vector<14x112xf32>
    %41 = arith.mulf %40, %27 : vector<14x112xf32>
    %cst_21 = arith.constant 0.000000e+00 : f32
    %42 = vector.broadcast %cst_21 : f32 to vector<14x112xf32>
    %43 = arith.subf %42, %22 : vector<14x112xf32>
    %44 = arith.mulf %43, %22 : vector<14x112xf32>
    %45 = math.exp %44 : vector<14x112xf32>
    %46 = arith.mulf %41, %45 : vector<14x112xf32>
    %cst_22 = arith.constant 1.000000e+00 : f32
    %47 = vector.broadcast %cst_22 : f32 to vector<14x112xf32>
    %48 = arith.subf %47, %46 : vector<14x112xf32>
    %49 = arith.mulf %21, %48 : vector<14x112xf32>
    %cst_23 = arith.constant 1.000000e+00 : f32
    %50 = vector.broadcast %cst_23 : f32 to vector<14x112xf32>
    %51 = arith.addf %50, %49 : vector<14x112xf32>
    %52 = arith.mulf %14, %51 : vector<14x112xf32>
    %cst_24 = arith.constant 0.000000e+00 : f32
    %53 = vector.broadcast %cst_24 : f32 to vector<1x112xf32>
    %54 = vector.extract_strided_slice %52 {offsets = [0, 0], sizes = [13, 112], strides = [1, 1]} : vector<14x112xf32> to vector<13x112xf32>
    %55 = tpu.concatenate %53, %54 in 0 : vector<1x112xf32>, vector<13x112xf32> -> vector<14x112xf32>
    %56 = vector.extract_strided_slice %52 {offsets = [1, 0], sizes = [13, 112], strides = [1, 1]} : vector<14x112xf32> to vector<13x112xf32>
    %57 = tpu.concatenate %56, %53 in 0 : vector<13x112xf32>, vector<1x112xf32> -> vector<14x112xf32>
    %58 = tpu.concatenate %55, %52, %57 in 1 : vector<14x112xf32>, vector<14x112xf32>, vector<14x112xf32> -> vector<14x336xf32>
    %c0_25 = arith.constant 0 : index
    %c0_26 = arith.constant 0 : index
    %59 = vector.load %arg5[%c0_25, %c0_26] : memref<336x112xf32, #tpu.memory_space<vmem>>, vector<336x112xf32>
    %cst_27 = arith.constant dense<0.000000e+00> : vector<14x112xf32>
    %60 = tpu.matmul %58, %59, %cst_27 {dimension_numbers = #tpu.dot_dimension_numbers<[1], [0], [0], [1], [0, 0, 1, 1], [], []>} : vector<14x336xf32>, vector<336x112xf32>, vector<14x112xf32> -> vector<14x112xf32>
    %c0_28 = arith.constant 0 : index
    %c0_29 = arith.constant 0 : index
    %61 = vector.load %arg6[%c0_28, %c0_29] : memref<1x112xf32, #tpu.memory_space<vmem>>, vector<1x112xf32>
    %62 = vector.broadcast %61 : vector<1x112xf32> to vector<14x112xf32>
    %63 = arith.addf %60, %62 : vector<14x112xf32>
    %cst_30 = arith.constant 5.000000e-01 : f32
    %64 = vector.broadcast %cst_30 : f32 to vector<14x112xf32>
    %65 = arith.mulf %64, %63 : vector<14x112xf32>
    %cst_31 = arith.constant 0.707106769 : f32
    %66 = vector.broadcast %cst_31 : f32 to vector<14x112xf32>
    %67 = arith.mulf %63, %66 : vector<14x112xf32>
    %cst_32 = arith.constant 0.000000e+00 : f32
    %68 = vector.broadcast %cst_32 : f32 to vector<14x112xf32>
    %69 = arith.cmpf oge, %67, %68 : vector<14x112xf32>
    %cst_33 = arith.constant 1.000000e+00 : f32
    %cst_34 = arith.constant -1.000000e+00 : f32
    %70 = vector.broadcast %cst_33 : f32 to vector<14x112xf32>
    %71 = vector.broadcast %cst_34 : f32 to vector<14x112xf32>
    %72 = arith.select %69, %70, %71 : vector<14x112xi1>, vector<14x112xf32>
    %73 = math.absf %67 : vector<14x112xf32>
    %cst_35 = arith.constant 0.327591091 : f32
    %74 = vector.broadcast %cst_35 : f32 to vector<14x112xf32>
    %75 = arith.mulf %74, %73 : vector<14x112xf32>
    %cst_36 = arith.constant 1.000000e+00 : f32
    %76 = vector.broadcast %cst_36 : f32 to vector<14x112xf32>
    %77 = arith.addf %76, %75 : vector<14x112xf32>
    %78 = tpu.reciprocal %77 {approx = true} : vector<14x112xf32> -> vector<14x112xf32>
    %cst_37 = arith.constant 1.06140542 : f32
    %79 = vector.broadcast %cst_37 : f32 to vector<14x112xf32>
    %80 = arith.mulf %79, %78 : vector<14x112xf32>
    %cst_38 = arith.constant -1.45315206 : f32
    %81 = vector.broadcast %cst_38 : f32 to vector<14x112xf32>
    %82 = arith.addf %80, %81 : vector<14x112xf32>
    %83 = arith.mulf %82, %78 : vector<14x112xf32>
    %cst_39 = arith.constant 1.42141378 : f32
    %84 = vector.broadcast %cst_39 : f32 to vector<14x112xf32>
    %85 = arith.addf %83, %84 : vector<14x112xf32>
    %86 = arith.mulf %85, %78 : vector<14x112xf32>
    %cst_40 = arith.constant -0.284496725 : f32
    %87 = vector.broadcast %cst_40 : f32 to vector<14x112xf32>
    %88 = arith.addf %86, %87 : vector<14x112xf32>
    %89 = arith.mulf %88, %78 : vector<14x112xf32>
    %cst_41 = arith.constant 0.254829586 : f32
    %90 = vector.broadcast %cst_41 : f32 to vector<14x112xf32>
    %91 = arith.addf %89, %90 : vector<14x112xf32>
    %92 = arith.mulf %91, %78 : vector<14x112xf32>
    %cst_42 = arith.constant 0.000000e+00 : f32
    %93 = vector.broadcast %cst_42 : f32 to vector<14x112xf32>
    %94 = arith.subf %93, %73 : vector<14x112xf32>
    %95 = arith.mulf %94, %73 : vector<14x112xf32>
    %96 = math.exp %95 : vector<14x112xf32>
    %97 = arith.mulf %92, %96 : vector<14x112xf32>
    %cst_43 = arith.constant 1.000000e+00 : f32
    %98 = vector.broadcast %cst_43 : f32 to vector<14x112xf32>
    %99 = arith.subf %98, %97 : vector<14x112xf32>
    %100 = arith.mulf %72, %99 : vector<14x112xf32>
    %cst_44 = arith.constant 1.000000e+00 : f32
    %101 = vector.broadcast %cst_44 : f32 to vector<14x112xf32>
    %102 = arith.addf %101, %100 : vector<14x112xf32>
    %103 = arith.mulf %65, %102 : vector<14x112xf32>
    %c0_45 = arith.constant 0 : index
    %c0_46 = arith.constant 0 : index
    %104 = vector.load %arg7[%c0_45, %c0_46] : memref<21x14xf32, #tpu.memory_space<vmem>>, vector<21x14xf32>
    %cst_47 = arith.constant dense<0.000000e+00> : vector<21x112xf32>
    %105 = tpu.matmul %104, %103, %cst_47 {dimension_numbers = #tpu.dot_dimension_numbers<[1], [0], [0], [1], [0, 0, 1, 1], [], []>} : vector<21x14xf32>, vector<14x112xf32>, vector<21x112xf32> -> vector<21x112xf32>
    %106 = vector.extract_strided_slice %105 {offsets = [0, 0], sizes = [7, 112], strides = [1, 1]} : vector<21x112xf32> to vector<7x112xf32>
    %107 = vector.extract_strided_slice %105 {offsets = [7, 0], sizes = [7, 112], strides = [1, 1]} : vector<21x112xf32> to vector<7x112xf32>
    %108 = vector.extract_strided_slice %105 {offsets = [14, 0], sizes = [7, 112], strides = [1, 1]} : vector<21x112xf32> to vector<7x112xf32>
    %109 = tpu.concatenate %106, %107, %108 in 1 : vector<7x112xf32>, vector<7x112xf32>, vector<7x112xf32> -> vector<7x336xf32>
    %c0_48 = arith.constant 0 : index
    %c0_49 = arith.constant 0 : index
    %110 = vector.load %arg8[%c0_48, %c0_49] : memref<336x112xf32, #tpu.memory_space<vmem>>, vector<336x112xf32>
    %cst_50 = arith.constant dense<0.000000e+00> : vector<7x112xf32>
    %111 = tpu.matmul %109, %110, %cst_50 {dimension_numbers = #tpu.dot_dimension_numbers<[1], [0], [0], [1], [0, 0, 1, 1], [], []>} : vector<7x336xf32>, vector<336x112xf32>, vector<7x112xf32> -> vector<7x112xf32>
    %c0_51 = arith.constant 0 : index
    %c0_52 = arith.constant 0 : index
    %112 = vector.load %arg9[%c0_51, %c0_52] : memref<1x112xf32, #tpu.memory_space<vmem>>, vector<1x112xf32>
    %113 = vector.broadcast %112 : vector<1x112xf32> to vector<7x112xf32>
    %114 = arith.addf %111, %113 : vector<7x112xf32>
    %cst_53 = arith.constant 5.000000e-01 : f32
    %115 = vector.broadcast %cst_53 : f32 to vector<7x112xf32>
    %116 = arith.mulf %115, %114 : vector<7x112xf32>
    %cst_54 = arith.constant 0.707106769 : f32
    %117 = vector.broadcast %cst_54 : f32 to vector<7x112xf32>
    %118 = arith.mulf %114, %117 : vector<7x112xf32>
    %cst_55 = arith.constant 0.000000e+00 : f32
    %119 = vector.broadcast %cst_55 : f32 to vector<7x112xf32>
    %120 = arith.cmpf oge, %118, %119 : vector<7x112xf32>
    %cst_56 = arith.constant 1.000000e+00 : f32
    %cst_57 = arith.constant -1.000000e+00 : f32
    %121 = vector.broadcast %cst_56 : f32 to vector<7x112xf32>
    %122 = vector.broadcast %cst_57 : f32 to vector<7x112xf32>
    %123 = arith.select %120, %121, %122 : vector<7x112xi1>, vector<7x112xf32>
    %124 = math.absf %118 : vector<7x112xf32>
    %cst_58 = arith.constant 0.327591091 : f32
    %125 = vector.broadcast %cst_58 : f32 to vector<7x112xf32>
    %126 = arith.mulf %125, %124 : vector<7x112xf32>
    %cst_59 = arith.constant 1.000000e+00 : f32
    %127 = vector.broadcast %cst_59 : f32 to vector<7x112xf32>
    %128 = arith.addf %127, %126 : vector<7x112xf32>
    %129 = tpu.reciprocal %128 {approx = true} : vector<7x112xf32> -> vector<7x112xf32>
    %cst_60 = arith.constant 1.06140542 : f32
    %130 = vector.broadcast %cst_60 : f32 to vector<7x112xf32>
    %131 = arith.mulf %130, %129 : vector<7x112xf32>
    %cst_61 = arith.constant -1.45315206 : f32
    %132 = vector.broadcast %cst_61 : f32 to vector<7x112xf32>
    %133 = arith.addf %131, %132 : vector<7x112xf32>
    %134 = arith.mulf %133, %129 : vector<7x112xf32>
    %cst_62 = arith.constant 1.42141378 : f32
    %135 = vector.broadcast %cst_62 : f32 to vector<7x112xf32>
    %136 = arith.addf %134, %135 : vector<7x112xf32>
    %137 = arith.mulf %136, %129 : vector<7x112xf32>
    %cst_63 = arith.constant -0.284496725 : f32
    %138 = vector.broadcast %cst_63 : f32 to vector<7x112xf32>
    %139 = arith.addf %137, %138 : vector<7x112xf32>
    %140 = arith.mulf %139, %129 : vector<7x112xf32>
    %cst_64 = arith.constant 0.254829586 : f32
    %141 = vector.broadcast %cst_64 : f32 to vector<7x112xf32>
    %142 = arith.addf %140, %141 : vector<7x112xf32>
    %143 = arith.mulf %142, %129 : vector<7x112xf32>
    %cst_65 = arith.constant 0.000000e+00 : f32
    %144 = vector.broadcast %cst_65 : f32 to vector<7x112xf32>
    %145 = arith.subf %144, %124 : vector<7x112xf32>
    %146 = arith.mulf %145, %124 : vector<7x112xf32>
    %147 = math.exp %146 : vector<7x112xf32>
    %148 = arith.mulf %143, %147 : vector<7x112xf32>
    %cst_66 = arith.constant 1.000000e+00 : f32
    %149 = vector.broadcast %cst_66 : f32 to vector<7x112xf32>
    %150 = arith.subf %149, %148 : vector<7x112xf32>
    %151 = arith.mulf %123, %150 : vector<7x112xf32>
    %cst_67 = arith.constant 1.000000e+00 : f32
    %152 = vector.broadcast %cst_67 : f32 to vector<7x112xf32>
    %153 = arith.addf %152, %151 : vector<7x112xf32>
    %154 = arith.mulf %116, %153 : vector<7x112xf32>
    %cst_68 = arith.constant 0.000000e+00 : f32
    %155 = vector.broadcast %cst_68 : f32 to vector<1x112xf32>
    %156 = vector.extract_strided_slice %154 {offsets = [0, 0], sizes = [6, 112], strides = [1, 1]} : vector<7x112xf32> to vector<6x112xf32>
    %157 = tpu.concatenate %155, %156 in 0 : vector<1x112xf32>, vector<6x112xf32> -> vector<7x112xf32>
    %158 = vector.extract_strided_slice %154 {offsets = [1, 0], sizes = [6, 112], strides = [1, 1]} : vector<7x112xf32> to vector<6x112xf32>
    %159 = tpu.concatenate %158, %155 in 0 : vector<6x112xf32>, vector<1x112xf32> -> vector<7x112xf32>
    %160 = tpu.concatenate %157, %154, %159 in 1 : vector<7x112xf32>, vector<7x112xf32>, vector<7x112xf32> -> vector<7x336xf32>
    %c0_69 = arith.constant 0 : index
    %c0_70 = arith.constant 0 : index
    %161 = vector.load %arg10[%c0_69, %c0_70] : memref<336x112xf32, #tpu.memory_space<vmem>>, vector<336x112xf32>
    %cst_71 = arith.constant dense<0.000000e+00> : vector<7x112xf32>
    %162 = tpu.matmul %160, %161, %cst_71 {dimension_numbers = #tpu.dot_dimension_numbers<[1], [0], [0], [1], [0, 0, 1, 1], [], []>} : vector<7x336xf32>, vector<336x112xf32>, vector<7x112xf32> -> vector<7x112xf32>
    %c0_72 = arith.constant 0 : index
    %c0_73 = arith.constant 0 : index
    %163 = vector.load %arg11[%c0_72, %c0_73] : memref<1x112xf32, #tpu.memory_space<vmem>>, vector<1x112xf32>
    %164 = vector.broadcast %163 : vector<1x112xf32> to vector<7x112xf32>
    %165 = arith.addf %162, %164 : vector<7x112xf32>
    %cst_74 = arith.constant 5.000000e-01 : f32
    %166 = vector.broadcast %cst_74 : f32 to vector<7x112xf32>
    %167 = arith.mulf %166, %165 : vector<7x112xf32>
    %cst_75 = arith.constant 0.707106769 : f32
    %168 = vector.broadcast %cst_75 : f32 to vector<7x112xf32>
    %169 = arith.mulf %165, %168 : vector<7x112xf32>
    %cst_76 = arith.constant 0.000000e+00 : f32
    %170 = vector.broadcast %cst_76 : f32 to vector<7x112xf32>
    %171 = arith.cmpf oge, %169, %170 : vector<7x112xf32>
    %cst_77 = arith.constant 1.000000e+00 : f32
    %cst_78 = arith.constant -1.000000e+00 : f32
    %172 = vector.broadcast %cst_77 : f32 to vector<7x112xf32>
    %173 = vector.broadcast %cst_78 : f32 to vector<7x112xf32>
    %174 = arith.select %171, %172, %173 : vector<7x112xi1>, vector<7x112xf32>
    %175 = math.absf %169 : vector<7x112xf32>
    %cst_79 = arith.constant 0.327591091 : f32
    %176 = vector.broadcast %cst_79 : f32 to vector<7x112xf32>
    %177 = arith.mulf %176, %175 : vector<7x112xf32>
    %cst_80 = arith.constant 1.000000e+00 : f32
    %178 = vector.broadcast %cst_80 : f32 to vector<7x112xf32>
    %179 = arith.addf %178, %177 : vector<7x112xf32>
    %180 = tpu.reciprocal %179 {approx = true} : vector<7x112xf32> -> vector<7x112xf32>
    %cst_81 = arith.constant 1.06140542 : f32
    %181 = vector.broadcast %cst_81 : f32 to vector<7x112xf32>
    %182 = arith.mulf %181, %180 : vector<7x112xf32>
    %cst_82 = arith.constant -1.45315206 : f32
    %183 = vector.broadcast %cst_82 : f32 to vector<7x112xf32>
    %184 = arith.addf %182, %183 : vector<7x112xf32>
    %185 = arith.mulf %184, %180 : vector<7x112xf32>
    %cst_83 = arith.constant 1.42141378 : f32
    %186 = vector.broadcast %cst_83 : f32 to vector<7x112xf32>
    %187 = arith.addf %185, %186 : vector<7x112xf32>
    %188 = arith.mulf %187, %180 : vector<7x112xf32>
    %cst_84 = arith.constant -0.284496725 : f32
    %189 = vector.broadcast %cst_84 : f32 to vector<7x112xf32>
    %190 = arith.addf %188, %189 : vector<7x112xf32>
    %191 = arith.mulf %190, %180 : vector<7x112xf32>
    %cst_85 = arith.constant 0.254829586 : f32
    %192 = vector.broadcast %cst_85 : f32 to vector<7x112xf32>
    %193 = arith.addf %191, %192 : vector<7x112xf32>
    %194 = arith.mulf %193, %180 : vector<7x112xf32>
    %cst_86 = arith.constant 0.000000e+00 : f32
    %195 = vector.broadcast %cst_86 : f32 to vector<7x112xf32>
    %196 = arith.subf %195, %175 : vector<7x112xf32>
    %197 = arith.mulf %196, %175 : vector<7x112xf32>
    %198 = math.exp %197 : vector<7x112xf32>
    %199 = arith.mulf %194, %198 : vector<7x112xf32>
    %cst_87 = arith.constant 1.000000e+00 : f32
    %200 = vector.broadcast %cst_87 : f32 to vector<7x112xf32>
    %201 = arith.subf %200, %199 : vector<7x112xf32>
    %202 = arith.mulf %174, %201 : vector<7x112xf32>
    %cst_88 = arith.constant 1.000000e+00 : f32
    %203 = vector.broadcast %cst_88 : f32 to vector<7x112xf32>
    %204 = arith.addf %203, %202 : vector<7x112xf32>
    %205 = arith.mulf %167, %204 : vector<7x112xf32>
    %c0_89 = arith.constant 0 : index
    %c0_90 = arith.constant 0 : index
    %206 = vector.load %arg12[%c0_89, %c0_90] : memref<12x7xf32, #tpu.memory_space<vmem>>, vector<12x7xf32>
    %cst_91 = arith.constant dense<0.000000e+00> : vector<12x112xf32>
    %207 = tpu.matmul %206, %205, %cst_91 {dimension_numbers = #tpu.dot_dimension_numbers<[1], [0], [0], [1], [0, 0, 1, 1], [], []>} : vector<12x7xf32>, vector<7x112xf32>, vector<12x112xf32> -> vector<12x112xf32>
    %208 = vector.extract_strided_slice %207 {offsets = [0, 0], sizes = [4, 112], strides = [1, 1]} : vector<12x112xf32> to vector<4x112xf32>
    %209 = vector.extract_strided_slice %207 {offsets = [4, 0], sizes = [4, 112], strides = [1, 1]} : vector<12x112xf32> to vector<4x112xf32>
    %210 = vector.extract_strided_slice %207 {offsets = [8, 0], sizes = [4, 112], strides = [1, 1]} : vector<12x112xf32> to vector<4x112xf32>
    %211 = tpu.concatenate %208, %209, %210 in 1 : vector<4x112xf32>, vector<4x112xf32>, vector<4x112xf32> -> vector<4x336xf32>
    %c0_92 = arith.constant 0 : index
    %c0_93 = arith.constant 0 : index
    %212 = vector.load %arg13[%c0_92, %c0_93] : memref<336x64xf32, #tpu.memory_space<vmem>>, vector<336x64xf32>
    %cst_94 = arith.constant dense<0.000000e+00> : vector<4x64xf32>
    %213 = tpu.matmul %211, %212, %cst_94 {dimension_numbers = #tpu.dot_dimension_numbers<[1], [0], [0], [1], [0, 0, 1, 1], [], []>} : vector<4x336xf32>, vector<336x64xf32>, vector<4x64xf32> -> vector<4x64xf32>
    %c0_95 = arith.constant 0 : index
    %c0_96 = arith.constant 0 : index
    %214 = vector.load %arg14[%c0_95, %c0_96] : memref<1x64xf32, #tpu.memory_space<vmem>>, vector<1x64xf32>
    %215 = vector.broadcast %214 : vector<1x64xf32> to vector<4x64xf32>
    %216 = arith.addf %213, %215 : vector<4x64xf32>
    %cst_97 = arith.constant 5.000000e-01 : f32
    %217 = vector.broadcast %cst_97 : f32 to vector<4x64xf32>
    %218 = arith.mulf %217, %216 : vector<4x64xf32>
    %cst_98 = arith.constant 0.707106769 : f32
    %219 = vector.broadcast %cst_98 : f32 to vector<4x64xf32>
    %220 = arith.mulf %216, %219 : vector<4x64xf32>
    %cst_99 = arith.constant 0.000000e+00 : f32
    %221 = vector.broadcast %cst_99 : f32 to vector<4x64xf32>
    %222 = arith.cmpf oge, %220, %221 : vector<4x64xf32>
    %cst_100 = arith.constant 1.000000e+00 : f32
    %cst_101 = arith.constant -1.000000e+00 : f32
    %223 = vector.broadcast %cst_100 : f32 to vector<4x64xf32>
    %224 = vector.broadcast %cst_101 : f32 to vector<4x64xf32>
    %225 = arith.select %222, %223, %224 : vector<4x64xi1>, vector<4x64xf32>
    %226 = math.absf %220 : vector<4x64xf32>
    %cst_102 = arith.constant 0.327591091 : f32
    %227 = vector.broadcast %cst_102 : f32 to vector<4x64xf32>
    %228 = arith.mulf %227, %226 : vector<4x64xf32>
    %cst_103 = arith.constant 1.000000e+00 : f32
    %229 = vector.broadcast %cst_103 : f32 to vector<4x64xf32>
    %230 = arith.addf %229, %228 : vector<4x64xf32>
    %231 = tpu.reciprocal %230 {approx = true} : vector<4x64xf32> -> vector<4x64xf32>
    %cst_104 = arith.constant 1.06140542 : f32
    %232 = vector.broadcast %cst_104 : f32 to vector<4x64xf32>
    %233 = arith.mulf %232, %231 : vector<4x64xf32>
    %cst_105 = arith.constant -1.45315206 : f32
    %234 = vector.broadcast %cst_105 : f32 to vector<4x64xf32>
    %235 = arith.addf %233, %234 : vector<4x64xf32>
    %236 = arith.mulf %235, %231 : vector<4x64xf32>
    %cst_106 = arith.constant 1.42141378 : f32
    %237 = vector.broadcast %cst_106 : f32 to vector<4x64xf32>
    %238 = arith.addf %236, %237 : vector<4x64xf32>
    %239 = arith.mulf %238, %231 : vector<4x64xf32>
    %cst_107 = arith.constant -0.284496725 : f32
    %240 = vector.broadcast %cst_107 : f32 to vector<4x64xf32>
    %241 = arith.addf %239, %240 : vector<4x64xf32>
    %242 = arith.mulf %241, %231 : vector<4x64xf32>
    %cst_108 = arith.constant 0.254829586 : f32
    %243 = vector.broadcast %cst_108 : f32 to vector<4x64xf32>
    %244 = arith.addf %242, %243 : vector<4x64xf32>
    %245 = arith.mulf %244, %231 : vector<4x64xf32>
    %cst_109 = arith.constant 0.000000e+00 : f32
    %246 = vector.broadcast %cst_109 : f32 to vector<4x64xf32>
    %247 = arith.subf %246, %226 : vector<4x64xf32>
    %248 = arith.mulf %247, %226 : vector<4x64xf32>
    %249 = math.exp %248 : vector<4x64xf32>
    %250 = arith.mulf %245, %249 : vector<4x64xf32>
    %cst_110 = arith.constant 1.000000e+00 : f32
    %251 = vector.broadcast %cst_110 : f32 to vector<4x64xf32>
    %252 = arith.subf %251, %250 : vector<4x64xf32>
    %253 = arith.mulf %225, %252 : vector<4x64xf32>
    %cst_111 = arith.constant 1.000000e+00 : f32
    %254 = vector.broadcast %cst_111 : f32 to vector<4x64xf32>
    %255 = arith.addf %254, %253 : vector<4x64xf32>
    %256 = arith.mulf %218, %255 : vector<4x64xf32>
    %257 = vector.extract_strided_slice %256 {offsets = [0, 0], sizes = [1, 64], strides = [1, 1]} : vector<4x64xf32> to vector<1x64xf32>
    %258 = vector.extract_strided_slice %256 {offsets = [1, 0], sizes = [1, 64], strides = [1, 1]} : vector<4x64xf32> to vector<1x64xf32>
    %259 = vector.extract_strided_slice %256 {offsets = [2, 0], sizes = [1, 64], strides = [1, 1]} : vector<4x64xf32> to vector<1x64xf32>
    %260 = vector.extract_strided_slice %256 {offsets = [3, 0], sizes = [1, 64], strides = [1, 1]} : vector<4x64xf32> to vector<1x64xf32>
    %261 = tpu.concatenate %257, %258, %259, %260 in 1 : vector<1x64xf32>, vector<1x64xf32>, vector<1x64xf32>, vector<1x64xf32> -> vector<1x256xf32>
    %c0_112 = arith.constant 0 : index
    %c0_113 = arith.constant 0 : index
    %262 = vector.load %arg15[%c0_112, %c0_113] : memref<256x40xf32, #tpu.memory_space<vmem>>, vector<256x40xf32>
    %cst_114 = arith.constant dense<0.000000e+00> : vector<1x40xf32>
    %263 = tpu.matmul %261, %262, %cst_114 {dimension_numbers = #tpu.dot_dimension_numbers<[1], [0], [0], [1], [0, 0, 1, 1], [], []>} : vector<1x256xf32>, vector<256x40xf32>, vector<1x40xf32> -> vector<1x40xf32>
    %c0_115 = arith.constant 0 : index
    %c0_116 = arith.constant 0 : index
    %264 = vector.load %arg16[%c0_115, %c0_116] : memref<1x40xf32, #tpu.memory_space<vmem>>, vector<1x40xf32>
    %265 = arith.addf %263, %264 : vector<1x40xf32>
    %266 = vector.shape_cast %265 : vector<1x40xf32> to vector<1x1x40xf32>
    %c0_117 = arith.constant 0 : index
    %c0_118 = arith.constant 0 : index
    %c0_119 = arith.constant 0 : index
    %267 = vector.load %arg17[%c0_117, %c0_118, %c0_119] : memref<1x1x40xf32, #tpu.memory_space<vmem>>, vector<1x1x40xf32>
    tpu.vector_store %arg17[%c0_117, %c0_118, %c0_119], %266 {strides = array<i32>} : memref<1x1x40xf32, #tpu.memory_space<vmem>>, vector<1x1x40xf32>,
    return
  }
  func.func @transform_0(%arg0: i32) -> (i32, i32, i32) {
    %c0_i32 = arith.constant 0 : i32
    %c0_i32_0 = arith.constant 0 : i32
    %c0_i32_1 = arith.constant 0 : i32
    return %arg0, %c0_i32, %c0_i32_0 : i32, i32, i32
  }
  func.func @transform_1(%arg0: i32) -> (i32, i32) {
    %c0_i32 = arith.constant 0 : i32
    %c0_i32_0 = arith.constant 0 : i32
    %c0_i32_1 = arith.constant 0 : i32
    return %c0_i32, %c0_i32_0 : i32, i32
  }
  func.func @transform_2(%arg0: i32) -> (i32, i32) {
    %c0_i32 = arith.constant 0 : i32
    %c0_i32_0 = arith.constant 0 : i32
    %c0_i32_1 = arith.constant 0 : i32
    return %c0_i32, %c0_i32_0 : i32, i32
  }
  func.func @transform_3(%arg0: i32) -> (i32, i32) {
    %c0_i32 = arith.constant 0 : i32
    %c0_i32_0 = arith.constant 0 : i32
    %c0_i32_1 = arith.constant 0 : i32
    return %c0_i32, %c0_i32_0 : i32, i32
  }
  func.func @transform_4(%arg0: i32) -> (i32, i32) {
    %c0_i32 = arith.constant 0 : i32
    %c0_i32_0 = arith.constant 0 : i32
    %c0_i32_1 = arith.constant 0 : i32
    return %c0_i32, %c0_i32_0 : i32, i32
  }
  func.func @transform_5(%arg0: i32) -> (i32, i32) {
    %c0_i32 = arith.constant 0 : i32
    %c0_i32_0 = arith.constant 0 : i32
    %c0_i32_1 = arith.constant 0 : i32
    return %c0_i32, %c0_i32_0 : i32, i32
  }
  func.func @transform_6(%arg0: i32) -> (i32, i32) {
    %c0_i32 = arith.constant 0 : i32
    %c0_i32_0 = arith.constant 0 : i32
    %c0_i32_1 = arith.constant 0 : i32
    return %c0_i32, %c0_i32_0 : i32, i32
  }
  func.func @transform_7(%arg0: i32) -> (i32, i32) {
    %c0_i32 = arith.constant 0 : i32
    %c0_i32_0 = arith.constant 0 : i32
    %c0_i32_1 = arith.constant 0 : i32
    return %c0_i32, %c0_i32_0 : i32, i32
  }
  func.func @transform_8(%arg0: i32) -> (i32, i32) {
    %c0_i32 = arith.constant 0 : i32
    %c0_i32_0 = arith.constant 0 : i32
    %c0_i32_1 = arith.constant 0 : i32
    return %c0_i32, %c0_i32_0 : i32, i32
  }
  func.func @transform_9(%arg0: i32) -> (i32, i32) {
    %c0_i32 = arith.constant 0 : i32
    %c0_i32_0 = arith.constant 0 : i32
    %c0_i32_1 = arith.constant 0 : i32
    return %c0_i32, %c0_i32_0 : i32, i32
  }
  func.func @transform_10(%arg0: i32) -> (i32, i32) {
    %c0_i32 = arith.constant 0 : i32
    %c0_i32_0 = arith.constant 0 : i32
    %c0_i32_1 = arith.constant 0 : i32
    return %c0_i32, %c0_i32_0 : i32, i32
  }
  func.func @transform_11(%arg0: i32) -> (i32, i32) {
    %c0_i32 = arith.constant 0 : i32
    %c0_i32_0 = arith.constant 0 : i32
    %c0_i32_1 = arith.constant 0 : i32
    return %c0_i32, %c0_i32_0 : i32, i32
  }
  func.func @transform_12(%arg0: i32) -> (i32, i32) {
    %c0_i32 = arith.constant 0 : i32
    %c0_i32_0 = arith.constant 0 : i32
    %c0_i32_1 = arith.constant 0 : i32
    return %c0_i32, %c0_i32_0 : i32, i32
  }
  func.func @transform_13(%arg0: i32) -> (i32, i32) {
    %c0_i32 = arith.constant 0 : i32
    %c0_i32_0 = arith.constant 0 : i32
    %c0_i32_1 = arith.constant 0 : i32
    return %c0_i32, %c0_i32_0 : i32, i32
  }
  func.func @transform_14(%arg0: i32) -> (i32, i32) {
    %c0_i32 = arith.constant 0 : i32
    %c0_i32_0 = arith.constant 0 : i32
    %c0_i32_1 = arith.constant 0 : i32
    return %c0_i32, %c0_i32_0 : i32, i32
  }
  func.func @transform_15(%arg0: i32) -> (i32, i32) {
    %c0_i32 = arith.constant 0 : i32
    %c0_i32_0 = arith.constant 0 : i32
    %c0_i32_1 = arith.constant 0 : i32
    return %c0_i32, %c0_i32_0 : i32, i32
  }
  func.func @transform_16(%arg0: i32) -> (i32, i32, i32) {
    %c0_i32 = arith.constant 0 : i32
    %c0_i32_0 = arith.constant 0 : i32
    %c0_i32_1 = arith.constant 0 : i32
    return %arg0, %c0_i32, %c0_i32_0 : i32, i32, i32
  }
}

</mosaic_0001>

<bundles_post_ra>
// kernel: cnn_encoder_forward.1
= control target key start
LH: loop header
LB: loop body
LE: loop exit
PB: predicated region body
PF: predicated region fallthrough
CT: control target
= control target key end

     0   :  { %s4273_s0 = inlined_call_operand.vmem [shape: f32[2,28,28], index: 0, kind: input, shape index: {}]   ;;  %s4274_s1 = inlined_call_operand.vmem [shape: f32[42,28], index: 1, kind: input, shape index: {}]   ;;  %s4275_s2 = inlined_call_operand.hbm [shape: f32[84,112], index: 2, kind: input, shape index: {}]   ;;  %s4276_s3 = inlined_call_operand.vmem [shape: f32[1,112], index: 3, kind: input, shape index: {}]   ;;  %s4277_s4 = inlined_call_operand.vmem [shape: f32[336,112], index: 4, kind: input, shape index: {}]   ;;  %s4278_s5 = inlined_call_operand.vmem [shape: f32[1,112], index: 5, kind: input, shape index: {}]   ;;  %s4279_s6 = inlined_call_operand.vmem [shape: f32[21,14], index: 6, kind: input, shape index: {}]   ;;  %s4280_s7 = inlined_call_operand.vmem [shape: f32[336,112], index: 7, kind: input, shape index: {}]   ;;  %s4281_s8 = inlined_call_operand.hbm [shape: f32[1,112], index: 8, kind: input, shape index: {}]   ;;  %s4282_s9 = inlined_call_operand.vmem [shape: f32[336,112], index: 9, kind: input, shape index: {}]   ;;  %s4283_s10 = inlined_call_operand.hbm [shape: f32[1,112], index: 10, kind: input, shape index: {}]   ;;  %s4284_s11 = inlined_call_operand.vmem [shape: f32[12,7], index: 11, kind: input, shape index: {}]   ;;  %s4285_s12 = inlined_call_operand.vmem [shape: f32[336,64], index: 12, kind: input, shape index: {}]   ;;  %s4286_s13 = inlined_call_operand.hbm [shape: f32[1,64], index: 13, kind: input, shape index: {}]   ;;  %s4287_s14 = inlined_call_operand.vmem [shape: f32[256,40], index: 14, kind: input, shape index: {}]   ;;  %s4288_s15 = inlined_call_operand.hbm [shape: f32[1,40], index: 15, kind: input, shape index: {}]   ;;  %s4289_s16 = inlined_call_operand.vmem [shape: f32[2,1,40], index: 16, kind: output, shape index: {}]  }
   0x1   :  { %4294 = sst [smem:[#allocation14_spill]] %s4273_s0 }
   0x2   :  { %4295 = sst [smem:[#allocation15_spill]] %s4287_s14 }
   0x3   :  { %4296 = sst [smem:[#allocation16_spill]] %s4289_s16 }
   0x4   :  { %21 = vsyncpa [#allocation3], 0 }
   0x5   :  { %22 = vsyncpa [#allocation5], 0 }
   0x6   :  { %23 = vsyncpa [#allocation8], 0  ;;  %s3363_s21 = smov 0  }
   0x7 LB: > { %4297 = sst [smem:[#allocation13_spill]] %s3259_s21  ;;  %s3261_s22 = smov [#allocation4]   ;;  %s3259_s21 = sphi %s3363_s21, %s29_s21  }
   0x8   : > { %s445_s23 = sshll.u32 %s3261_s22, 4  ;;  %s3369_s24 = sadd.s32 4294967295, %s3259_s21   ;;  %s3374_s23 = int_to_ptr.vmem [resolvable:$true] %s445_s23 }
   0x9   : > { %p2287_p0 = scmp.ge.s32.totalorder %s3259_s21, 1  ;;  %p401_p1 = scmp.lt.s32.totalorder %s3259_s21, 3 }
   0xa   : > { %p4292_p2 = scmp.eq.s32.totalorder %s3369_s24, 0  ;;  %s3262_s26 = smov [#allocation7]  }
   0xb   : > { %p3376_p3 = pnand %p2287_p0, %p401_p1  ;;  %s476_s27 = sshll.u32 %s3262_s26, 4  ;;  %s3382_s27 = int_to_ptr.vmem [resolvable:$true] %s476_s27 }
   0xc   : > { %s3263_s28 = smov [#allocation2]   ;;  %s3264_s0 = smov [#allocation6]  }
   0xd   : > { %s4298_s25 = scalar_select %p3376_p3, 1, 0 }
   0xe   : > { %p3017_p4 = pneg %p3376_p3  ;;  %s416_s29 = sshll.u32 %s3263_s28, 4  ;;  %s3390_s29 = int_to_ptr.vmem [resolvable:$true] %s416_s29 }
   0xf   : > { %s3392_s17 = sshll.u32 %s3264_s0, 4  ;;  %s3101_s20 = scalar_lea.hbm %s4281_s8, 16  ;;  %s460_s17 = int_to_ptr.vmem [resolvable:$true] %s3392_s17 }
  0x10   : > { %p3386_p5 = pnand %p4292_p2, %p3017_p4  ;;  %p3102_p6 = scmp.ne.s32.totalorder %s4281_s8, %s3101_s20 }
  0x11   : > { %p3108_p10 = scmp.lt.u32.totalorder %s3101_s20, %s4281_s8 }
  0x12   : > { %p3402_p7 = pneg %p3386_p5 }
  0x14   : > { %p3104_p8 = pnand %p3402_p7, %p3102_p6 }
  0x16   : > { %p3105_p9 = pneg %p3104_p8 }
  0x18   : > { %p3110_p11 = pnand %p3108_p10, %p3105_p9 }
  0x1a   : > { %3113 = shalt.err (!%p3110_p11)
}
  0x1b   : > { %s3114_s18 = scalar_lea.vmem %s3374_s23, 16  ;;  %s3121_s19 = scalar_lea.vmem %s3374_s23, 32 }
  0x1c   : > { %p3115_p12 = scmp.ne.s32.totalorder %s3374_s23, %s3114_s18  ;;  %p3122_p1 = scmp.lt.s32.totalorder %s3374_s23, %s3374_s23 }
  0x1d   : > { %p3123_p4 = scmp.lt.s32.totalorder %s3121_s19, %s3114_s18 }
  0x1e   : > { %p3117_p13 = pnand %p3115_p12, %p3402_p7 }
  0x1f   : > { %p3124_p6 = por %p3123_p4, %p3122_p1 }
  0x20   : > { %p3118_p0 = pneg %p3117_p13 }
  0x22   : > { %p3125_p8 = pnand %p3124_p6, %p3118_p0 }
  0x24   : > { %3128 = shalt.err (!%p3125_p8)
}
  0x25   : > { %3023 = dma.hbm_to_vmem [thread:$0]  (!%p3386_p5), %s4281_s8, 16, %s3374_s23, [#allocation5]  }
  0x26   : > { %s3129_s0 = scalar_lea.hbm %s4286_s13, 16 }
  0x27   : > { %p3130_p9 = scmp.ne.s32.totalorder %s4286_s13, %s3129_s0  ;;  %p3136_p12 = scmp.lt.u32.totalorder %s3129_s0, %s4286_s13 }
  0x29   : > { %p3132_p10 = pnand %p3130_p9, %p3402_p7 }
  0x2b   : > { %p3133_p11 = pneg %p3132_p10 }
  0x2d   : > { %p3138_p13 = pnand %p3136_p12, %p3133_p11 }
  0x2f   : > { %3141 = shalt.err (!%p3138_p13)
}
  0x30   : > { %s3142_s23 = scalar_lea.vmem %s3382_s27, 16  ;;  %s3149_s14 = scalar_lea.vmem %s3382_s27, 32 }
  0x31   : > { %p3143_p0 = scmp.ne.s32.totalorder %s3382_s27, %s3142_s23  ;;  %p3150_p6 = scmp.lt.s32.totalorder %s3382_s27, %s3382_s27 }
  0x32   : > { %p3151_p8 = scmp.lt.s32.totalorder %s3149_s14, %s3142_s23 }
  0x33   : > { %p3145_p1 = pnand %p3143_p0, %p3402_p7 }
  0x34   : > { %p3152_p9 = por %p3151_p8, %p3150_p6 }
  0x35   : > { %p3146_p4 = pneg %p3145_p1 }
  0x37   : > { %p3153_p10 = pnand %p3152_p9, %p3146_p4 }
  0x39   : > { %3156 = shalt.err (!%p3153_p10)
}
  0x3a   : > { %3029 = dma.hbm_to_vmem [thread:$0]  (!%p3386_p5), %s4286_s13, 16, %s3382_s27, [#allocation8]  }
  0x3b   : > { %s3157_s26 = scalar_lea.hbm %s4275_s2, 1408 }
  0x3c   : > { %p3158_p11 = scmp.ne.s32.totalorder %s4275_s2, %s3157_s26  ;;  %p3164_p0 = scmp.lt.u32.totalorder %s3157_s26, %s4275_s2 }
  0x3e   : > { %p3160_p12 = pnand %p3158_p11, %p3402_p7 }
  0x40   : > { %p3161_p13 = pneg %p3160_p12 }
  0x42   : > { %p3166_p1 = pnand %p3164_p0, %p3161_p13 }
  0x44   : > { %3169 = shalt.err (!%p3166_p1)
}
  0x45   : > { %s3170_s27 = scalar_lea.vmem %s3390_s29, 1408  ;;  %p3178_p9 = scmp.lt.s32.totalorder %s3390_s29, %s3390_s29 }
  0x46   : > { %p3171_p4 = scmp.ne.s32.totalorder %s3390_s29, %s3170_s27  ;;  %p3179_p10 = scmp.lt.s32.totalorder %s3170_s27, %s3170_s27 }
  0x48   : > { %p3173_p6 = pnand %p3171_p4, %p3402_p7  ;;  %p3180_p11 = por %p3179_p10, %p3178_p9 }
  0x4a   : > { %p3174_p8 = pneg %p3173_p6 }
  0x4c   : > { %p3181_p12 = pnand %p3180_p11, %p3174_p8 }
  0x4e   : > { %3184 = shalt.err (!%p3181_p12)
}
  0x4f   : > { %s3265_s14 = smov 128   ;;  %s3266_s16 = smov 8  }
  0x50   : > { %3020 = dma.hbm_to_vmem [thread:$0]  (!%p3386_p5), %s4275_s2, 1408, %s3390_s29, [#allocation3], %s3265_s14, %s3265_s14, %s3266_s16  }
  0x51   : > { %s3185_s0 = scalar_lea.hbm %s4283_s10, 16 }
  0x52   : > { %p3186_p13 = scmp.ne.s32.totalorder %s4283_s10, %s3185_s0  ;;  %p3192_p4 = scmp.lt.u32.totalorder %s3185_s0, %s4283_s10 }
  0x54   : > { %p3188_p0 = pnand %p3186_p13, %p3402_p7 }
  0x56   : > { %p3189_p1 = pneg %p3188_p0 }
  0x58   : > { %p3194_p6 = pnand %p3192_p4, %p3189_p1 }
  0x5a   : > { %3197 = shalt.err (!%p3194_p6)
}
  0x5b   : > { %s3198_s21 = scalar_lea.vmem %s460_s17, 16  ;;  %s3205_s29 = scalar_lea.vmem %s460_s17, 32 }
  0x5c   : > { %p3199_p8 = scmp.ne.s32.totalorder %s460_s17, %s3198_s21  ;;  %p3206_p11 = scmp.lt.s32.totalorder %s460_s17, %s460_s17 }
  0x5d   : > { %p3207_p12 = scmp.lt.s32.totalorder %s3205_s29, %s3198_s21 }
  0x5e   : > { %p3201_p9 = pnand %p3199_p8, %p3402_p7 }
  0x5f   : > { %p3208_p2 = por %p3207_p12, %p3206_p11 }
  0x60   : > { %p3202_p10 = pneg %p3201_p9 }
  0x62   : > { %p3209_p3 = pnand %p3208_p2, %p3202_p10 }
  0x64   : > { %3212 = shalt.err (!%p3209_p3)
}
  0x65   : > { %3026 = dma.hbm_to_vmem [thread:$0]  (!%p3386_p5), %s4283_s10, 16, %s460_s17, [#allocation5]  }
  0x66   : > { %s3267_s20 = smov [#allocation9]   ;;  %s3213_s18 = scalar_lea.hbm %s4288_s15, 16 }
  0x67   : > { %s490_s22 = sshll.u32 %s3267_s20, 4  ;;  %p3214_p13 = scmp.ne.s32.totalorder %s4288_s15, %s3213_s18  ;;  %s491_s22 = int_to_ptr.vmem [resolvable:$true] %s490_s22 }
  0x68   : > { %p3220_p0 = scmp.lt.u32.totalorder %s3213_s18, %s4288_s15 }
  0x69   : > { %p3216_p2 = pnand %p3214_p13, %p3402_p7 }
  0x6b   : > { %p3217_p3 = pneg %p3216_p2 }
  0x6d   : > { %p3222_p1 = pnand %p3220_p0, %p3217_p3 }
  0x6f   : > { %3225 = shalt.err (!%p3222_p1)
}
  0x70   : > { %s3226_s17 = scalar_lea.vmem %s491_s22, 16  ;;  %s3233_s29 = scalar_lea.vmem %s491_s22, 32 }
  0x71   : > { %p3227_p4 = scmp.ne.s32.totalorder %s491_s22, %s3226_s17  ;;  %p3234_p9 = scmp.lt.s32.totalorder %s491_s22, %s491_s22 }
  0x72   : > { %p3235_p10 = scmp.lt.s32.totalorder %s3233_s29, %s3226_s17 }
  0x73   : > { %p3229_p6 = pnand %p3227_p4, %p3402_p7 }
  0x74   : > { %p3236_p11 = por %p3235_p10, %p3234_p9 }
  0x75   : > { %p3230_p8 = pneg %p3229_p6 }
  0x77   : > { %p3237_p12 = pnand %p3236_p11, %p3230_p8 }
  0x79   : > { %3240 = shalt.err (!%p3237_p12)
}
  0x7a   : > { %3032 = dma.hbm_to_vmem [thread:$0]  (!%p3386_p5), %s4288_s15, 16, %s491_s22, [#allocation8]  }
  0x7b   : > { %p4301_p13 = scmp.ne.s32.totalorder %s4298_s25, 0 }
  0x7c   : > { %p4302_p2 = scmp.eq.s32.totalorder (!%p4301_p13), %s3369_s24, 0 }
  0x7d   : > { %511 = sbr.rel (%p4301_p13) target bundleno = 3092 (0xc14), region = 84 }
  0x84   : > { %3246 = dma.done.wait (%p4302_p2), [#allocation3], 1408   ;;  %p4303_p7 = pmov %p4302_p2 }
  0x85   : > { %p4304_p3 = pmov %p4302_p2 }
  0x86   : > { %3248 = vsyncadd (%p4303_p7), [#allocation3], 4294965888 }
  0x87   : > { %3250 = dma.done.wait (%p4304_p3), [#allocation5], 32   ;;  %p4305_p0 = pmov %p4302_p2 }
  0x89   : > { %3252 = vsyncadd (%p4305_p0), [#allocation5], 4294967264  ;;  %p4306_p1 = pmov %p4305_p0 }
  0x8a   : > { %p4307_p5 = pmov %p4305_p0 }
  0x8b   : > { %3254 = dma.done.wait (%p4306_p1), [#allocation8], 32  }
  0x8c   : > { %3256 = vsyncadd (%p4307_p5), [#allocation8], 4294967264  ;;  %p575_p4 = scmp.lt.s32.totalorder %s3369_s24, 1  ;;  %s4308_s20 = sld [smem:[#allocation14_spill]]  ;;  %vm612_vm0 = vcmask 1043456   ;;  %vm593_vm1 = vcmask 228352  }
  0x8d   : > { %v587_v5 = vld [vmem:[%s4274_s1] sm:$0xff]  ;;  %vm3268_vm2 = vmmov 1   ;;  %v588_v7 = vld [vmem:[%s4274_s1 + $0x8] sm:$0xff]  ;;  %v589_v8 = vld [vmem:[%s4274_s1 + $0x10] sm:$0xff]  ;;  %vm714_vm4 = vcmask 1041408   ;;  %s3269_s30 = smov 28  }
  0x8e   : > { %s4314_s24 = smov (!%p575_p4, %s3369_s24), 1  ;;  %vm2743_vm3 = vmpackc.low %vm612_vm0, %vm3268_vm2  ;;  %2594 = vmatprep.mubr.msk.f32.mxu0 %vm593_vm1, %v587_v5  ;;  %v590_v9 = vld [vmem:[%s4274_s1 + $0x18] sm:$0xff]  ;;  %v591_v10 = vld [vmem:[%s4274_s1 + $0x20] sm:$0xff]  ;;  %s3270_s28 = smov 56   ;;  %vm741_vm5 = vcmask 457728   ;;  %vm762_vm6 = vcmask 687104  }
  0x8f   : > { %s2331_s25 = sshll.u32 %s4314_s24, 5  ;;  %v592_v11 = vld [vmem:[%s4274_s1 + $0x28] sm:$0x3]  ;;  %v744_v12 = vld [vmem:[#allocation2] sm:$0xff]  ;;  %v746_v14 = vld [vmem:[#allocation2 + $0x10] sm:$0xff]  ;;  %vm908_vm9 = vcmask 1046528  }
  0x90   : > { %v745_v13 = vld [vmem:[#allocation2 + $0x8] sm:$0xff]  ;;  %v747_v16 = vld [vmem:[#allocation2 + $0x18] sm:$0xff]  ;;  %v748_v18 = vld [vmem:[#allocation2 + $0x20] sm:$0xff]  ;;  %vm901_vm10 = vcmask 1040384   ;;  %s3272_s23 = smov 112   ;;  %s3273_s27 = smov 96  }
  0x91   : > { %v2748_v15 = vpack.c.bf16 %v745_v13, %v744_v12  ;;  %v2752_v17 = vpack.c.bf16 %v747_v16, %v746_v14  ;;  %v749_v19 = vld [vmem:[#allocation2 + $0x28] sm:$0xff]  ;;  %v750_v21 = vld [vmem:[#allocation2 + $0x30] sm:$0xff]  ;;  %v751_v22 = vld [vmem:[#allocation2 + $0x38] sm:$0xff]  ;;  %vm913_vm11 = vcmask 1044480   ;;  %vm983_vm12 = vcmask 654336   ;;  %s4309_s21 = sld [smem:[#allocation15_spill]] }
  0x92   : > { %s579_s22 = scalar_lea.vmem %s4308_s20, %s2331_s25  ;;  %v2756_v20 = vpack.c.bf16 %v749_v19, %v748_v18  ;;  %v2760_v23 = vpack.c.bf16 %v751_v22, %v750_v21  ;;  %v752_v24 = vld [vmem:[#allocation2 + $0x40] sm:$0xff]  ;;  %v753_v25 = vld [vmem:[#allocation2 + $0x48] sm:$0xff]  ;;  %v754_v29 = vld [vmem:[#allocation2 + $0x50] sm:$0xf]  ;;  %vm931_vm13 = vcmask 785408   ;;  %vm928_vm14 = vcmask 916480  }
  0x93   : > { %v583_v0 = vld [vmem:[%s579_s22] sm:$0xff]  ;;  %v584_v1 = vld [vmem:[%s579_s22 + $0x8] sm:$0xff]  ;;  %v585_v2 = vld [vmem:[%s579_s22 + $0x10] sm:$0xff]  ;;  %2749 = vmatprep.subr.bf16.mxu1 %v2748_v15  ;;  %v2764_v26 = vpack.c.bf16 %v753_v25, %v752_v24  ;;  %vm3275_vm15 = vmmov 0   ;;  %s4311_s25 = sld [smem:[#allocation16_spill]] }
  0x94   : > { %v2738_v3 = vpack.c.bf16 %v584_v1, %v583_v0  ;;  %v586_v4 = vld [vmem:[%s579_s22 + $0x18] sm:$0xf]  ;;  %2751 = vmatpush3.bf16.msra.mxu1 %v2748_v15  ;;  %v950_v52 = vld [vmem:[%s4277_s4 + $0x80] sm:$0xff]  ;;  %v951_v53 = vld [vmem:[%s4277_s4 + $0x88] sm:$0xff] }
  0x95   : > { %v2742_v6 = vpack.c.bf16 %v586_v4, %v585_v2  ;;  %2753 = vmatprep.subr.bf16.mxu1 %v2752_v17  ;;  %v934_v54 = vld [vmem:[%s4277_s4] sm:$0xff]  ;;  %v2768_v55 = vpack.c.bf16 %v951_v53, %v950_v52  ;;  %v935_v56 = vld [vmem:[%s4277_s4 + $0x8] sm:$0xff]  ;;  %v952_v57 = vld [vmem:[%s4277_s4 + $0x90] sm:$0xff] }
  0x96   : > { %2739 = vmatprep.subr.bf16.mxu0 %v2738_v3  ;;  %v953_v58 = vld [vmem:[%s4277_s4 + $0x98] sm:$0xff]  ;;  %v2770_v59 = vpack.c.bf16 %v935_v56, %v934_v54  ;;  %v936_v61 = vld [vmem:[%s4277_s4 + $0x10] sm:$0xff]  ;;  %v954_v63 = vld [vmem:[%s4277_s4 + $0xa0] sm:$0xff] }
  0x97   : > { %2741 = vmatpush3.bf16.msra.mxu0 %v2738_v3  ;;  %v2772_v60 = vpack.c.bf16 %v953_v58, %v952_v57  ;;  %v937_v62 = vld [vmem:[%s4277_s4 + $0x18] sm:$0xff]  ;;  %v955_v0 = vld [vmem:[%s4277_s4 + $0xa8] sm:$0xff]  ;;  %v938_v2 = vld [vmem:[%s4277_s4 + $0x20] sm:$0xff]  ;;  %s4310_s17 = smov %s4309_s21 }
  0x98   : > { %2744 = vmatprep.subr.msk.bf16.mxu0 %vm2743_vm3, %v2742_v6  ;;  %2755 = vmatpush3.bf16.msra.mxu1 %v2752_v17  ;;  %v2774_v1 = vpack.c.bf16 %v937_v62, %v936_v61  ;;  %v2776_v3 = vpack.c.bf16 %v955_v0, %v954_v63  ;;  %v939_v4 = vld [vmem:[%s4277_s4 + $0x28] sm:$0xff]  ;;  %v966_v5 = vld [vmem:[%s4277_s4 + $0x100] sm:$0xff]  ;;  %v940_v13 = vld [vmem:[%s4277_s4 + $0x30] sm:$0xff] }
  0x99   : > { %2757 = vmatprep.subr.bf16.mxu1 %v2756_v20  ;;  %v2778_v12 = vpack.c.bf16 %v939_v4, %v938_v2  ;;  %v941_v16 = vld [vmem:[%s4277_s4 + $0x38] sm:$0xff]  ;;  %v970_v17 = vld [vmem:[%s4277_s4 + $0x120] sm:$0xff]  ;;  %v971_v18 = vld [vmem:[%s4277_s4 + $0x128] sm:$0xff] }
  0x9a   : > { %v958_v19 = vld [vmem:[%s4277_s4 + $0xc0] sm:$0xff]  ;;  %v2808_v21 = vpack.c.bf16 %v971_v18, %v970_v17  ;;  %v972_v22 = vld [vmem:[%s4277_s4 + $0x130] sm:$0xff]  ;;  %v2782_v24 = vpack.c.bf16 %v941_v16, %v940_v13 }
  0x9b   : > { %2747 = vmatpush3.bf16.msk.msra.mxu0 %vm2743_vm3, %v2742_v6  ;;  %v967_v6 = vld [vmem:[%s4277_s4 + $0x108] sm:$0xff]  ;;  %v948_v18 = vld [vmem:[%s4277_s4 + $0x70] sm:$0xff]  ;;  %vm1203_vm3 = vcmask 1045504  }
  0x9c   : > { %2759 = vmatpush3.bf16.msra.mxu1 %v2756_v20  ;;  %2769 = vmatprep.subr.bf16.mxu0 %v2768_v55  ;;  %v959_v20 = vld [vmem:[%s4277_s4 + $0xc8] sm:$0xff] }
  0x9d   : > { %2761 = vmatprep.subr.bf16.mxu1 %v2760_v23  ;;  %v2784_v25 = vpack.c.bf16 %v959_v20, %v958_v19  ;;  %v949_v19 = vld [vmem:[%s4277_s4 + $0x78] sm:$0xff] }
  0x9e   : > { %2595 = vmatmul.mubr.msk.f32.vlgmr.msra.gmra.mrb[0].mxu0 %vm593_vm1, %v588_v7  ;;  %v956_v7 = vld [vmem:[%s4277_s4 + $0xb0] sm:$0xff] }
  0x9f   : > { %2597 = vmatprep.mubr.msk.f32.mxu0 %vm593_vm1, %v589_v8  ;;  %2771 = vmatpush3.bf16.msra.mxu0 %v2770_v59  ;;  %v957_v8 = vld [vmem:[%s4277_s4 + $0xb8] sm:$0xff] }
  0xa0   : > { %2763 = vmatpush3.bf16.msra.mxu1 %v2760_v23  ;;  %2773 = vmatprep.subr.bf16.mxu0 %v2772_v60  ;;  %v2780_v15 = vpack.c.bf16 %v957_v8, %v956_v7  ;;  %v973_v23 = vld [vmem:[%s4277_s4 + $0x138] sm:$0xff] }
  0xa1   : > { %2765 = vmatprep.subr.bf16.mxu1 %v2764_v26 }
  0xa2   : > { %2598 = vmatmul.mubr.msk.f32.gmra.mrb[2].mxu0 %vm593_vm1, %v590_v9  ;;  %v2800_v9 = vpack.c.bf16 %v967_v6, %v966_v5 }
  0xa3   : > { %2600 = vmatprep.mubr.msk.f32.mxu0 %vm593_vm1, %v591_v10  ;;  %v968_v10 = vld [vmem:[%s4277_s4 + $0x110] sm:$0xff]  ;;  %2775 = vmatpush3.bf16.msra.mxu0 %v2774_v1 }
  0xa4   : > { %2767 = vmatpush3.bf16.msra.mxu1 %v2764_v26  ;;  %2777 = vmatprep.subr.bf16.mxu0 %v2776_v3  ;;  %v942_v26 = vld [vmem:[%s4277_s4 + $0x40] sm:$0xff] }
  0xa5   : > { %2623 = vmatprep.subr.msk.mxu1 %vm612_vm0, %v754_v29 }
  0xa6   : > { %2601 = vmatmul.mubr.msk.f32.gmra.mrb[4].mxu0 %vm593_vm1, %v592_v11  ;;  %v969_v11 = vld [vmem:[%s4277_s4 + $0x118] sm:$0xff] }
  0xa7   : > { %v2804_v14 = vpack.c.bf16 %v969_v11, %v968_v10  ;;  %2779 = vmatpush3.bf16.msra.mxu0 %v2778_v12 }
  0xa8   : > { %2624 = vmatpush3.msk.msra.mxu1 %vm612_vm0, %v754_v29  ;;  %2781 = vmatprep.subr.bf16.mxu0 %v2780_v15  ;;  %v961_v29 = vld [vmem:[%s4277_s4 + $0xd8] sm:$0xff] }
  0xa9   : > { %2801 = vmatprep.subr.bf16.mxu1 %v2800_v9  ;;  %v965_v15 = vld [vmem:[%s4277_s4 + $0xf8] sm:$0xff] }
  0xab   : > { %2783 = vmatpush3.bf16.msra.mxu0 %v2782_v24 }
  0xac   : > { %2785 = vmatprep.subr.bf16.mxu0 %v2784_v25 }
 0x171   : > { %v2596_v27 = vpop.f32.mrb[0].mxu0 }
 0x172   : > { %v682_v28 = vpop.f32.mrb[1].mxu0  ;;  %v715_v33 = vrot.slane %v2596_v27, 6 }
 0x175   : > { %v2599_v30 = vpop.f32.mrb[2].mxu0 }
 0x176   : > { %v718_v31 = vrot.slane %v2599_v30, 6  ;;  %v692_v32 = vpop.f32.mrb[3].mxu0  ;;  %v728_v40 = vrot.slane %v2599_v30, 4  ;;  %v2812_v30 = vpack.c.bf16 %v973_v23, %v972_v22  ;;  %v974_v22 = vld [vmem:[%s4277_s4 + $0x140] sm:$0xff]  ;;  %v975_v23 = vld [vmem:[%s4277_s4 + $0x148] sm:$0xff] }
 0x177   : > { %v716_v34 = vrot.slane %v692_v32, 6 }
 0x179   : > { %v2602_v35 = vpop.f32.mrb[4].mxu0  ;;  %v717_v36 = vsel %vm714_vm4, %v715_v33, %v716_v34  ;;  %v719_v37 = vsel %vm714_vm4, %v716_v34, %v718_v31  ;;  %v944_v33 = vld [vmem:[%s4277_s4 + $0x50] sm:$0xff]  ;;  %v945_v34 = vld [vmem:[%s4277_s4 + $0x58] sm:$0xff] }
 0x17a   : > { %v731_v38 = vrot.slane %v2602_v35, 4  ;;  %720 = vrot.lane.b32.xlu0 %v717_v36, %s3269_s30  ;;  %v702_v39 = vpop.f32.mrb[5].mxu0  ;;  %v962_v35 = vld [vmem:[%s4277_s4 + $0xe0] sm:$0xff]  ;;  %v963_v36 = vld [vmem:[%s4277_s4 + $0xe8] sm:$0xff] }
 0x17b   : > { %v729_v41 = vrot.slane %v702_v39, 4  ;;  %v946_v39 = vld [vmem:[%s4277_s4 + $0x60] sm:$0xff] }
 0x17d   : > { %v730_v42 = vsel %vm612_vm0, %v728_v40, %v729_v41  ;;  %v732_v43 = vsel %vm612_vm0, %v729_v41, %v731_v38  ;;  %v2792_v38 = vpack.c.bf16 %v963_v36, %v962_v35  ;;  %v947_v40 = vld [vmem:[%s4277_s4 + $0x68] sm:$0xff] }
 0x17e   : > { %722 = vrot.lane.b32.xlu0 %v719_v37, %s3269_s30  ;;  %733 = vrot.lane.b32.xlu1 %v730_v42, %s3270_s28  ;;  %v2790_v37 = vpack.c.bf16 %v945_v34, %v944_v33  ;;  %v2794_v41 = vpack.c.bf16 %v947_v40, %v946_v39  ;;  %v2309_v42 = vld [vmem:[%s4276_s3] ss:$0 sm:$0xff]  ;;  %s582_s30 = scalar_lea.vmem %s4311_s25, %s4314_s24 }
 0x182   : > { %735 = vrot.lane.b32.xlu1 %v732_v43, %s3270_s28 }
 0x1ec   : > { %v721_v44 = vpop.permute.xlu0 %720 }
 0x1ed   : > { %v739_v45 = vsel %vm593_vm1, %v682_v28, %v721_v44  ;;  %v960_v28 = vld [vmem:[%s4277_s4 + $0xd0] sm:$0xff] }
 0x1ee   : > { %v2788_v32 = vpack.c.bf16 %v961_v29, %v960_v28 }
 0x1f0   : > { %v734_v46 = vpop.permute.xlu1 %733  ;;  %v723_v47 = vpop.permute.xlu0 %722 }
 0x1f1   : > { %v742_v48 = vsel %vm741_vm5, %v739_v45, %v734_v46  ;;  %v740_v49 = vsel %vm593_vm1, %v2596_v27, %v723_v47  ;;  %v943_v27 = vld [vmem:[%s4277_s4 + $0x48] sm:$0xff] }
 0x1f2   : > { %2625 = vmatprep.mubr.msk.f32.mxu1 %vm762_vm6, %v742_v48  ;;  %v2786_v31 = vpack.c.bf16 %v943_v27, %v942_v26  ;;  %v2816_v26 = vpack.c.bf16 %v975_v23, %v974_v22 }
 0x1f4   : > { %v736_v50 = vpop.permute.xlu1 %735  ;;  %2787 = vmatpush3.bf16.msra.mxu0 %v2786_v31  ;;  %v3271_v31 = vmov -1.0  }
 0x1f5   : > { %v743_v51 = vsel %vm741_vm5, %v740_v49, %v736_v50  ;;  %2789 = vmatprep.subr.bf16.mxu0 %v2788_v32  ;;  %vm2822_vm5 = vmpackc.low %vm1203_vm3, %vm3268_vm2 }
 0x1f6   : > { %2626 = vmatmul.mubr.msk.f32.vlgmr.msra.gmra.mrb[0].mxu1 %vm762_vm6, %v743_v51  ;;  %vm1193_vm6 = vcmask 113664  }
 0x1f7   : > { %2803 = vmatpush3.bf16.msra.mxu1 %v2800_v9 }
 0x1f8   : > { %2805 = vmatprep.subr.bf16.mxu1 %v2804_v14  ;;  %2791 = vmatpush3.bf16.msra.mxu0 %v2790_v37 }
 0x1f9   : > { %2793 = vmatprep.subr.bf16.mxu0 %v2792_v38 }
 0x1fb   : > { %2807 = vmatpush3.bf16.msra.mxu1 %v2804_v14  ;;  %v964_v14 = vld [vmem:[%s4277_s4 + $0xf0] sm:$0xff] }
 0x1fc   : > { %2809 = vmatprep.subr.bf16.mxu1 %v2808_v21  ;;  %2795 = vmatpush3.bf16.msra.mxu0 %v2794_v41  ;;  %v2796_v17 = vpack.c.bf16 %v965_v15, %v964_v14 }
 0x1fe   : > { %2797 = vmatprep.subr.bf16.mxu0 %v2796_v17 }
 0x1ff   : > { %2811 = vmatpush3.bf16.msra.mxu1 %v2808_v21  ;;  %v2798_v21 = vpack.c.bf16 %v949_v19, %v948_v18 }
 0x200   : > { %2813 = vmatprep.subr.bf16.mxu1 %v2812_v30 }
 0x201   : > { %2799 = vmatpush3.bf16.msra.mxu0 %v2798_v21 }
 0x203   : > { %2815 = vmatpush3.bf16.msra.mxu1 %v2812_v30 }
 0x204   : > { %2817 = vmatprep.subr.bf16.mxu1 %v2816_v26 }
 0x207   : > { %2819 = vmatpush3.bf16.msra.mxu1 %v2816_v26 }
 0x2c9   : > { %v2627_v43 = vpop.f32.mrb[0].mxu1 }
 0x2ca   : > { %v3675_v44 = vadd.f32 %v2627_v43, %v2309_v42  ;;  %v838_v45 = vpop.f32.mrb[1].mxu1 }
 0x2cb   : > { %v3677_v46 = vadd.f32 %v2309_v42, %v838_v45 }
 0x2cc   : > { %v850_v47 = vmul.f32 0.70710677, %v3675_v44  ;;  %v848_v37 = vmul.f32 0.5, %v3675_v44 }
 0x2cd   : > { %v849_v48 = vmul.f32 0.70710677, %v3677_v46  ;;  %v847_v39 = vmul.f32 0.5, %v3677_v46 }
 0x2ce   : > { %v856_v49 = vand.u32 2147483647, %v850_v47  ;;  %vm852_vm7 = vcmp.ge.f32.partialorder %v850_v47, 0.0 }
 0x2cf   : > { %v855_v50 = vand.u32 2147483647, %v849_v48  ;;  %vm851_vm8 = vcmp.ge.f32.partialorder %v849_v48, 0.0  ;;  %v854_v32 = vsel %vm852_vm7, 1.0, %v3271_v31 }
 0x2d0   : > { %v858_v51 = vmul.f32 0.3275911, %v856_v49  ;;  %v882_v55 = vsub.f32 0.0, %v856_v49  ;;  %v853_v35 = vsel %vm851_vm8, 1.0, %v3271_v31 }
 0x2d1   : > { %v857_v52 = vmul.f32 0.3275911, %v855_v50  ;;  %v881_v56 = vsub.f32 0.0, %v855_v50 }
 0x2d2   : > { %v860_v53 = vadd.f32 1.0, %v858_v51  ;;  %v884_v58 = vmul.f32 %v882_v55, %v856_v49 }
 0x2d3   : > { %v859_v54 = vadd.f32 1.0, %v857_v52  ;;  %v883_v61 = vmul.f32 %v881_v56, %v855_v50 }
 0x2d4   : > { %3073 = vrcp.f32 %v860_v53  ;;  %v887_v0 = vmul.f32 1.442695, %v884_v58 }
 0x2d5   : > { %3075 = vrcp.f32 %v859_v54  ;;  %v885_v3 = vmul.f32 1.442695, %v883_v61 }
 0x2d6   : > { %3077 = vpow2.f32 %v887_v0 }
 0x2d7   : > { %3079 = vpow2.f32 %v885_v3 }
 0x2de   : > { %v3074_v57 = vpop.eup %3073 }
 0x2df   : > { %v3076_v59 = vpop.eup %3075  ;;  %v864_v60 = vmul.f32 1.0614054, %v3074_v57 }
 0x2e0   : > { %v863_v62 = vmul.f32 1.0614054, %v3076_v59  ;;  %v3078_v24 = vpop.eup %3077 }
 0x2e1   : > { %v866_v63 = vadd.f32 -1.4531521, %v864_v60  ;;  %v3080_v27 = vpop.eup %3079  ;;  %v3276_v60 = vmov 0.0  }
 0x2e2   : > { %v865_v1 = vadd.f32 -1.4531521, %v863_v62 }
 0x2e3   : > { %v868_v2 = vmul.f32 %v3074_v57, %v866_v63  ;;  %v2313_v63 = vld [vmem:[%s4278_s5] ss:$0 sm:$0xff] }
 0x2e4   : > { %v867_v4 = vmul.f32 %v3076_v59, %v865_v1 }
 0x2e5   : > { %v870_v5 = vadd.f32 1.4214138, %v868_v2 }
 0x2e6   : > { %v869_v6 = vadd.f32 1.4214138, %v867_v4 }
 0x2e7   : > { %v872_v7 = vmul.f32 %v3074_v57, %v870_v5 }
 0x2e8   : > { %v871_v8 = vmul.f32 %v3076_v59, %v869_v6 }
 0x2e9   : > { %v874_v9 = vadd.f32 -0.28449672, %v872_v7 }
 0x2ea   : > { %v873_v10 = vadd.f32 -0.28449672, %v871_v8 }
 0x2eb   : > { %v876_v11 = vmul.f32 %v3074_v57, %v874_v9 }
 0x2ec   : > { %v875_v12 = vmul.f32 %v3076_v59, %v873_v10 }
 0x2ed   : > { %v878_v13 = vadd.f32 0.2548296, %v876_v11 }
 0x2ee   : > { %v877_v16 = vadd.f32 0.2548296, %v875_v12 }
 0x2ef   : > { %v880_v20 = vmul.f32 %v3074_v57, %v878_v13 }
 0x2f0   : > { %v879_v25 = vmul.f32 %v3076_v59, %v877_v16  ;;  %v3274_v59 = vmov 0.0|0.0  }
 0x2f1   : > { %v890_v28 = vmul.f32 %v3078_v24, %v880_v20  ;;  %2820 = vmatprep.subr.bf16.mxu0 %v3274_v59  ;;  %2856 = vmatprep.subr.bf16.mxu1 %v3274_v59 }
 0x2f2   : > { %v889_v29 = vmul.f32 %v3080_v27, %v879_v25 }
 0x2f3   : > { %v892_v30 = vsub.f32 1.0, %v890_v28 }
 0x2f4   : > { %v891_v33 = vsub.f32 1.0, %v889_v29 }
 0x2f5   : > { %v894_v34 = vmul.f32 %v892_v30, %v854_v32 }
 0x2f6   : > { %v893_v36 = vmul.f32 %v891_v33, %v853_v35 }
 0x2f7   : > { %v896_v38 = vadd.f32 1.0, %v894_v34 }
 0x2f8   : > { %v895_v40 = vadd.f32 1.0, %v893_v36 }
 0x2f9   : > { %v898_v41 = vmul.f32 %v896_v38, %v848_v37 }
 0x2fa   : > { %v897_v42 = vmul.f32 %v895_v40, %v847_v39 }
 0x2fb   : > { %v910_v43 = vrot.slane %v898_v41, 1  ;;  %v903_v45 = vrot.slane %v898_v41, 7 }
 0x2fc   : > { %915 = vrot.lane.b32.xlu0 %v897_v42, %s3272_s23  ;;  %v909_v47 = vrot.slane %v897_v42, 1  ;;  %v902_v48 = vrot.slane %v897_v42, 7 }
 0x2fd   : > { %v914_v44 = vsel %vm913_vm11, %v910_v43, 0.0 }
 0x2fe   : > { %v911_v49 = vsel %vm908_vm9, %v909_v47, %v910_v43  ;;  %v904_v50 = vsel %vm901_vm10, %v902_v48, %v903_v45  ;;  %v907_v52 = vsel %vm901_vm10, 0.0, %v902_v48 }
 0x2ff   : > { %922 = vrot.lane.b32.xlu1 %v911_v49, %s3273_s27 }
 0x300   : > { %917 = vrot.lane.b32.xlu0 %v898_v41, %s3272_s23 }
 0x303   : > { %924 = vrot.lane.b32.xlu1 %v914_v44, %s3273_s27 }
 0x36e   : > { %v916_v46 = vpop.permute.xlu0 %915 }
 0x36f   : > { %v929_v54 = vsel %vm928_vm14, %v907_v52, %v916_v46 }
 0x371   : > { %v923_v51 = vpop.permute.xlu1 %922 }
 0x372   : > { %2648 = vmatprep.mubr.msk.f32.mxu1 %vm983_vm12, %v923_v51  ;;  %v932_v53 = vsel %vm931_vm13, %v916_v46, %v923_v51  ;;  %v918_v55 = vpop.permute.xlu0 %917 }
 0x373   : > { %1052 = vmatprep.mubr.f32.mxu0 %v932_v53  ;;  %v930_v58 = vsel %vm928_vm14, %v904_v50, %v918_v55 }
 0x374   : > { %1053 = vmatmul.mubr.f32.vlgmr.msra.gmra.mrb[6].mxu0 %v929_v54 }
 0x375   : > { %v925_v56 = vpop.permute.xlu1 %924 }
 0x376   : > { %2649 = vmatmul.mubr.msk.f32.vlgmr.msra.gmra.mrb[2].mxu1 %vm983_vm12, %v925_v56  ;;  %v933_v57 = vsel %vm931_vm13, %v918_v55, %v925_v56 }
 0x377   : > { %1057 = vmatprep.mubr.f32.mxu0 %v933_v57  ;;  %2684 = vmatprep.mubr.msk.f32.mxu1 %vm3275_vm15, %v3276_v60 }
 0x378   : > { %1058 = vmatmul.mubr.f32.gmra.mrb[8].mxu0 %v930_v58 }
 0x379   : > { %2655 = vmatprep.mubr.msk.f32.mxu0 %vm3275_vm15, %v3276_v60 }
 0x447   : > { %v2387_v61 = vpop.f32.mrb[6].mxu0 }
 0x448   : > { %v2388_v62 = vpop.f32.mrb[7].mxu0 }
 0x449   : > { %v2389_v0 = vadd.f32 %v2388_v62, %v2387_v61  ;;  %v2650_v1 = vpop.f32.mrb[2].mxu1 }
 0x44a   : > { %v1129_v2 = vpop.f32.mrb[3].mxu1 }
 0x44b   : > { %v1055_v3 = vadd.f32 %v2389_v0, %v2313_v63  ;;  %v2390_v4 = vpop.f32.mrb[8].mxu0  ;;  %v1190_v0 = vld [vmem:[%s4279_s6] sm:$0xff] }
 0x44c   : > { %v2391_v5 = vpop.f32.mrb[9].mxu0 }
 0x44d   : > { %v1130_v6 = vadd.f32 %v1129_v2, %v1055_v3  ;;  %v2392_v7 = vadd.f32 %v2391_v5, %v2390_v4  ;;  %v1192_v2 = vld [vmem:[%s4279_s6 + $0x10] sm:$0x1f]  ;;  %v1320_v3 = vld [vmem:[%s4280_s7 + $0x80] sm:$0xff]  ;;  %v1321_v4 = vld [vmem:[%s4280_s7 + $0x88] sm:$0xff] }
 0x44e   : > { %v1304_v5 = vld [vmem:[%s4280_s7] sm:$0xff] }
 0x44f   : > { %v1140_v8 = vmul.f32 0.70710677, %v1130_v6  ;;  %v1060_v9 = vadd.f32 %v2392_v7, %v2313_v63  ;;  %v1138_v56 = vmul.f32 0.5, %v1130_v6  ;;  %v2824_v6 = vpack.c.bf16 %v1321_v4, %v1320_v3  ;;  %v1305_v7 = vld [vmem:[%s4280_s7 + $0x8] sm:$0xff]  ;;  %v1319_v3 = vld [vmem:[%s4280_s7 + $0x78] sm:$0xff] }
 0x451   : > { %v1146_v10 = vand.u32 2147483647, %v1140_v8  ;;  %v1135_v11 = vadd.f32 %v2650_v1, %v1060_v9  ;;  %vm1142_vm0 = vcmp.ge.f32.partialorder %v1140_v8, 0.0  ;;  %v1191_v1 = vld [vmem:[%s4279_s6 + $0x8] sm:$0xff]  ;;  %v1322_v8 = vld [vmem:[%s4280_s7 + $0x90] sm:$0xff]  ;;  %v1323_v9 = vld [vmem:[%s4280_s7 + $0x98] sm:$0xff] }
 0x452   : > { %v1144_v44 = vsel %vm1142_vm0, 1.0, %v3271_v31 }
 0x453   : > { %v1148_v12 = vmul.f32 0.3275911, %v1146_v10  ;;  %v1141_v13 = vmul.f32 0.70710677, %v1135_v11  ;;  %v1172_v18 = vsub.f32 0.0, %v1146_v10  ;;  %v1139_v57 = vmul.f32 0.5, %v1135_v11 }
 0x454   : > { %v2828_v11 = vpack.c.bf16 %v1323_v9, %v1322_v8 }
 0x455   : > { %v1150_v14 = vadd.f32 1.0, %v1148_v12  ;;  %v1147_v15 = vand.u32 2147483647, %v1141_v13  ;;  %v1174_v20 = vmul.f32 %v1172_v18, %v1146_v10  ;;  %vm1143_vm1 = vcmp.ge.f32.partialorder %v1141_v13, 0.0  ;;  %v1306_v12 = vld [vmem:[%s4280_s7 + $0x10] sm:$0xff]  ;;  %v1307_v13 = vld [vmem:[%s4280_s7 + $0x18] sm:$0xff] }
 0x456   : > { %v1145_v53 = vsel %vm1143_vm1, 1.0, %v3271_v31  ;;  %v2826_v10 = vpack.c.bf16 %v1305_v7, %v1304_v5  ;;  %v1337_v18 = vld [vmem:[%s4280_s7 + $0x108] sm:$0xff] }
 0x457   : > { %3081 = vrcp.f32 %v1150_v14  ;;  %v1149_v16 = vmul.f32 0.3275911, %v1147_v15  ;;  %v1173_v21 = vsub.f32 0.0, %v1147_v15  ;;  %v1176_v25 = vmul.f32 1.442695, %v1174_v20  ;;  %v1324_v14 = vld [vmem:[%s4280_s7 + $0xa0] sm:$0xff] }
 0x458   : > { %v1308_v20 = vld [vmem:[%s4280_s7 + $0x20] sm:$0xff] }
 0x459   : > { %v1151_v17 = vadd.f32 1.0, %v1149_v16  ;;  %v1175_v26 = vmul.f32 %v1173_v21, %v1147_v15  ;;  %v1325_v15 = vld [vmem:[%s4280_s7 + $0xa8] sm:$0xff]  ;;  %v2830_v16 = vpack.c.bf16 %v1307_v13, %v1306_v12 }
 0x45a   : > { %v1309_v21 = vld [vmem:[%s4280_s7 + $0x28] sm:$0xff] }
 0x45b   : > { %3083 = vrcp.f32 %v1151_v17  ;;  %v1178_v32 = vmul.f32 1.442695, %v1175_v26  ;;  %v1336_v17 = vld [vmem:[%s4280_s7 + $0x100] sm:$0xff]  ;;  %v1339_v26 = vld [vmem:[%s4280_s7 + $0x118] sm:$0xff] }
 0x45c   : > { %3085 = vpow2.f32 %v1176_v25  ;;  %v1338_v25 = vld [vmem:[%s4280_s7 + $0x110] sm:$0xff] }
 0x45d   : > { %3087 = vpow2.f32 %v1178_v32 }
 0x461   : > { %v3082_v19 = vpop.eup %3081 }
 0x462   : > { %v1154_v22 = vmul.f32 1.0614054, %v3082_v19 }
 0x464   : > { %v1156_v23 = vadd.f32 -1.4531521, %v1154_v22  ;;  %v2857_v22 = vpack.c.bf16 %v1337_v18, %v1336_v17 }
 0x465   : > { %v3084_v24 = vpop.eup %3083 }
 0x466   : > { %v1158_v27 = vmul.f32 %v3082_v19, %v1156_v23  ;;  %v1155_v28 = vmul.f32 1.0614054, %v3084_v24  ;;  %v3086_v43 = vpop.eup %3085  ;;  %v1326_v23 = vld [vmem:[%s4280_s7 + $0xb0] sm:$0xff]  ;;  %2858 = vmatpush3.bf16.msra.mxu1 %v2857_v22  ;;  %v1554_v22 = vld [vmem:[%s4282_s9 + $0x88] sm:$0xff] }
 0x467   : > { %v3088_v50 = vpop.eup %3087  ;;  %2859 = vmatprep.subr.bf16.mxu1 %v3274_v59 }
 0x468   : > { %v1160_v29 = vadd.f32 1.4214138, %v1158_v27  ;;  %v1157_v30 = vadd.f32 -1.4531521, %v1155_v28  ;;  %v2860_v27 = vpack.c.bf16 %v1339_v26, %v1338_v25  ;;  %v2834_v28 = vpack.c.bf16 %v1309_v21, %v1308_v20  ;;  %v1553_v21 = vld [vmem:[%s4282_s9 + $0x80] sm:$0xff]  ;;  %v1538_v25 = vld [vmem:[%s4282_s9 + $0x8] sm:$0xff] }
 0x469   : > { %v1555_v26 = vld [vmem:[%s4282_s9 + $0x90] sm:$0xff] }
 0x46a   : > { %v1162_v33 = vmul.f32 %v3082_v19, %v1160_v29  ;;  %v1159_v34 = vmul.f32 %v3084_v24, %v1157_v30  ;;  %v1340_v29 = vld [vmem:[%s4280_s7 + $0x120] sm:$0xff]  ;;  %v1341_v30 = vld [vmem:[%s4280_s7 + $0x128] sm:$0xff]  ;;  %2861 = vmatpush3.bf16.msra.mxu1 %v2860_v27  ;;  %v1556_v27 = vld [vmem:[%s4282_s9 + $0x98] sm:$0xff] }
 0x46b   : > { %2862 = vmatprep.subr.bf16.mxu1 %v3274_v59 }
 0x46c   : > { %v1164_v35 = vadd.f32 -0.28449672, %v1162_v33  ;;  %v1161_v36 = vadd.f32 1.4214138, %v1159_v34  ;;  %v1310_v33 = vld [vmem:[%s4280_s7 + $0x30] sm:$0xff]  ;;  %v1311_v34 = vld [vmem:[%s4280_s7 + $0x38] sm:$0xff] }
 0x46e   : > { %v1166_v37 = vmul.f32 %v3082_v19, %v1164_v35  ;;  %v1163_v38 = vmul.f32 %v3084_v24, %v1161_v36  ;;  %v1328_v35 = vld [vmem:[%s4280_s7 + $0xc0] sm:$0xff]  ;;  %v1329_v36 = vld [vmem:[%s4280_s7 + $0xc8] sm:$0xff] }
 0x470   : > { %v1168_v39 = vadd.f32 0.2548296, %v1166_v37  ;;  %v1165_v40 = vadd.f32 -0.28449672, %v1163_v38  ;;  %v2863_v37 = vpack.c.bf16 %v1341_v30, %v1340_v29  ;;  %v2838_v38 = vpack.c.bf16 %v1311_v34, %v1310_v33  ;;  %v1539_v30 = vld [vmem:[%s4282_s9 + $0x10] sm:$0xff]  ;;  %v1557_v33 = vld [vmem:[%s4282_s9 + $0xa0] sm:$0xff] }
 0x471   : > { %v2875_v29 = vpack.c.bf16 %v1556_v27, %v1555_v26  ;;  %v1558_v34 = vld [vmem:[%s4282_s9 + $0xa8] sm:$0xff] }
 0x472   : > { %v1170_v41 = vmul.f32 %v3082_v19, %v1168_v39  ;;  %v1167_v42 = vmul.f32 %v3084_v24, %v1165_v40  ;;  %v2832_v19 = vpack.c.bf16 %v1325_v15, %v1324_v14  ;;  %v1342_v39 = vld [vmem:[%s4280_s7 + $0x130] sm:$0xff]  ;;  %v1343_v40 = vld [vmem:[%s4280_s7 + $0x138] sm:$0xff]  ;;  %2864 = vmatpush3.bf16.msra.mxu1 %v2863_v37  ;;  %v1570_v37 = vld [vmem:[%s4282_s9 + $0x108] sm:$0xff] }
 0x473   : > { %2865 = vmatprep.subr.bf16.mxu1 %v3274_v59 }
 0x474   : > { %v1180_v45 = vmul.f32 %v3086_v43, %v1170_v41  ;;  %v1169_v47 = vadd.f32 0.2548296, %v1167_v42  ;;  %v2840_v41 = vpack.c.bf16 %v1329_v36, %v1328_v35  ;;  %v1312_v42 = vld [vmem:[%s4280_s7 + $0x40] sm:$0xff]  ;;  %v1313_v43 = vld [vmem:[%s4280_s7 + $0x48] sm:$0xff] }
 0x475   : > { %v1569_v36 = vld [vmem:[%s4282_s9 + $0x100] sm:$0xff] }
 0x476   : > { %v1182_v48 = vsub.f32 1.0, %v1180_v45  ;;  %v1171_v49 = vmul.f32 %v3084_v24, %v1169_v47  ;;  %v1327_v24 = vld [vmem:[%s4280_s7 + $0xb8] sm:$0xff]  ;;  %v1330_v45 = vld [vmem:[%s4280_s7 + $0xd0] sm:$0xff] }
 0x477   : > { %v2836_v32 = vpack.c.bf16 %v1327_v24, %v1326_v23  ;;  %v1331_v47 = vld [vmem:[%s4280_s7 + $0xd8] sm:$0xff]  ;;  %v1537_v23 = vld [vmem:[%s4282_s9] sm:$0xff]  ;;  %v2871_v24 = vpack.c.bf16 %v1554_v22, %v1553_v21 }
 0x478   : > { %v1184_v46 = vmul.f32 %v1182_v48, %v1144_v44  ;;  %v1181_v51 = vmul.f32 %v3088_v50, %v1171_v49  ;;  %v2866_v48 = vpack.c.bf16 %v1343_v40, %v1342_v39  ;;  %v2842_v49 = vpack.c.bf16 %v1313_v43, %v1312_v42  ;;  %v1314_v44 = vld [vmem:[%s4280_s7 + $0x50] sm:$0xff]  ;;  %v1541_v39 = vld [vmem:[%s4282_s9 + $0x20] sm:$0xff]  ;;  %v1542_v40 = vld [vmem:[%s4282_s9 + $0x28] sm:$0xff] }
 0x479   : > { %v2844_v50 = vpack.c.bf16 %v1331_v47, %v1330_v45  ;;  %v1559_v42 = vld [vmem:[%s4282_s9 + $0xb0] sm:$0xff]  ;;  %v1560_v43 = vld [vmem:[%s4282_s9 + $0xb8] sm:$0xff] }
 0x47a   : > { %v1183_v52 = vsub.f32 1.0, %v1181_v51  ;;  %v1186_v54 = vadd.f32 1.0, %v1184_v46  ;;  %v1315_v46 = vld [vmem:[%s4280_s7 + $0x58] sm:$0xff]  ;;  %v1332_v51 = vld [vmem:[%s4280_s7 + $0xe0] sm:$0xff]  ;;  %2867 = vmatpush3.bf16.msra.mxu1 %v2866_v48  ;;  %v1571_v45 = vld [vmem:[%s4282_s9 + $0x110] sm:$0xff] }
 0x47b   : > { %2868 = vmatprep.subr.bf16.mxu1 %v3274_v59  ;;  %v1572_v47 = vld [vmem:[%s4282_s9 + $0x118] sm:$0xff] }
 0x47c   : > { %v1185_v55 = vmul.f32 %v1183_v52, %v1145_v53  ;;  %v1188_v61 = vmul.f32 %v1186_v54, %v1138_v56  ;;  %v1333_v52 = vld [vmem:[%s4280_s7 + $0xe8] sm:$0xff]  ;;  %v2846_v53 = vpack.c.bf16 %v1315_v46, %v1314_v44  ;;  %v2907_v48 = vpack.c.bf16 %v1572_v47, %v1571_v45  ;;  %v1551_v47 = vld [vmem:[%s4282_s9 + $0x70] sm:$0xff] }
 0x47d   : > { %v2848_v54 = vpack.c.bf16 %v1333_v52, %v1332_v51  ;;  %v1317_v56 = vld [vmem:[%s4280_s7 + $0x68] sm:$0xff]  ;;  %v2883_v46 = vpack.c.bf16 %v1560_v43, %v1559_v42  ;;  %v1543_v51 = vld [vmem:[%s4282_s9 + $0x30] sm:$0xff]  ;;  %v1544_v52 = vld [vmem:[%s4282_s9 + $0x38] sm:$0xff] }
 0x47e   : > { %v1187_v58 = vadd.f32 1.0, %v1185_v55  ;;  %v1316_v55 = vld [vmem:[%s4280_s7 + $0x60] sm:$0xff]  ;;  %v1574_v44 = vld [vmem:[%s4282_s9 + $0x128] sm:$0xff]  ;;  %v1568_v42 = vld [vmem:[%s4282_s9 + $0xf8] sm:$0xff] }
 0x480   : > { %v1189_v62 = vmul.f32 %v1187_v58, %v1139_v57  ;;  %v2850_v57 = vpack.c.bf16 %v1317_v56, %v1316_v55  ;;  %v1344_v58 = vld [vmem:[%s4280_s7 + $0x140] sm:$0xff]  ;;  %v2885_v56 = vpack.c.bf16 %v1544_v52, %v1543_v51 }
 0x482   : > { %v2821_v63 = vpack.c.bf16 %v1189_v62, %v1188_v61  ;;  %v1345_v61 = vld [vmem:[%s4280_s7 + $0x148] sm:$0xff] }
 0x483   : > { %v2869_v62 = vpack.c.bf16 %v1345_v61, %v1344_v58  ;;  %v1576_v58 = vld [vmem:[%s4282_s9 + $0x138] sm:$0xff] }
 0x484   : > { %2823 = vmatpush3.bf16.msk.msra.mxu0 %vm2822_vm5, %v2821_v63  ;;  %v1334_v63 = vld [vmem:[%s4280_s7 + $0xf0] sm:$0xff] }
 0x485   : > { %2825 = vmatprep.subr.bf16.mxu0 %v2824_v6  ;;  %2870 = vmatpush3.bf16.msra.mxu1 %v2869_v62  ;;  %v1545_v62 = vld [vmem:[%s4282_s9 + $0x40] sm:$0xff] }
 0x486   : > { %2872 = vmatprep.subr.bf16.mxu1 %v2871_v24 }
 0x487   : > { %2656 = vmatmul.mubr.msk.f32.vlgmr.msra.gmra.mrb[10].mxu0 %vm1193_vm6, %v1190_v0  ;;  %v1335_v0 = vld [vmem:[%s4280_s7 + $0xf8] sm:$0xff] }
 0x488   : > { %2658 = vmatprep.mubr.msk.f32.mxu0 %vm3275_vm15, %v3276_v60  ;;  %2827 = vmatpush3.bf16.msra.mxu0 %v2826_v10 }
 0x489   : > { %2829 = vmatprep.subr.bf16.mxu0 %v2828_v11 }
 0x48b   : > { %2659 = vmatmul.mubr.msk.f32.gmra.mrb[12].mxu0 %vm1193_vm6, %v1191_v1  ;;  %v2852_v1 = vpack.c.bf16 %v1335_v0, %v1334_v63  ;;  %v1546_v63 = vld [vmem:[%s4282_s9 + $0x48] sm:$0xff]  ;;  %v1563_v0 = vld [vmem:[%s4282_s9 + $0xd0] sm:$0xff] }
 0x48c   : > { %2661 = vmatprep.mubr.msk.f32.mxu0 %vm3275_vm15, %v3276_v60  ;;  %2831 = vmatpush3.bf16.msra.mxu0 %v2830_v16 }
 0x48d   : > { %2833 = vmatprep.subr.bf16.mxu0 %v2832_v19 }
 0x48f   : > { %2662 = vmatmul.mubr.msk.f32.gmra.mrb[14].mxu0 %vm1193_vm6, %v1192_v2  ;;  %v1318_v2 = vld [vmem:[%s4280_s7 + $0x70] sm:$0xff] }
 0x490   : > { %2835 = vmatpush3.bf16.msra.mxu0 %v2834_v28  ;;  %v2854_v4 = vpack.c.bf16 %v1319_v3, %v1318_v2  ;;  %v2873_v28 = vpack.c.bf16 %v1538_v25, %v1537_v23  ;;  %v2889_v3 = vpack.c.bf16 %v1546_v63, %v1545_v62 }
 0x491   : > { %2837 = vmatprep.subr.bf16.mxu0 %v2836_v32  ;;  %v1540_v32 = vld [vmem:[%s4282_s9 + $0x18] sm:$0xff] }
 0x492   : > { %v2877_v35 = vpack.c.bf16 %v1540_v32, %v1539_v30 }
 0x494   : > { %2839 = vmatpush3.bf16.msra.mxu0 %v2838_v38  ;;  %v2879_v38 = vpack.c.bf16 %v1558_v34, %v1557_v33 }
 0x495   : > { %2841 = vmatprep.subr.bf16.mxu0 %v2840_v41  ;;  %v2904_v41 = vpack.c.bf16 %v1570_v37, %v1569_v36 }
 0x498   : > { %2843 = vmatpush3.bf16.msra.mxu0 %v2842_v49  ;;  %v2881_v49 = vpack.c.bf16 %v1542_v40, %v1541_v39  ;;  %v1578_v39 = vld [vmem:[%s4282_s9 + $0x148] sm:$0xff] }
 0x499   : > { %2845 = vmatprep.subr.bf16.mxu0 %v2844_v50  ;;  %v1573_v50 = vld [vmem:[%s4282_s9 + $0x120] sm:$0xff] }
 0x49a   : > { %v2910_v55 = vpack.c.bf16 %v1574_v44, %v1573_v50 }
 0x49c   : > { %2847 = vmatpush3.bf16.msra.mxu0 %v2846_v53  ;;  %v1561_v53 = vld [vmem:[%s4282_s9 + $0xc0] sm:$0xff] }
 0x49d   : > { %2849 = vmatprep.subr.bf16.mxu0 %v2848_v54  ;;  %v1562_v54 = vld [vmem:[%s4282_s9 + $0xc8] sm:$0xff] }
 0x49e   : > { %v2887_v61 = vpack.c.bf16 %v1562_v54, %v1561_v53 }
 0x4a0   : > { %2851 = vmatpush3.bf16.msra.mxu0 %v2850_v57  ;;  %v1575_v57 = vld [vmem:[%s4282_s9 + $0x130] sm:$0xff] }
 0x4a1   : > { %2853 = vmatprep.subr.bf16.mxu0 %v2852_v1  ;;  %v1564_v1 = vld [vmem:[%s4282_s9 + $0xd8] sm:$0xff]  ;;  %v2913_v2 = vpack.c.bf16 %v1576_v58, %v1575_v57 }
 0x4a4   : > { %2855 = vmatpush3.bf16.msra.mxu0 %v2854_v4  ;;  %v2891_v4 = vpack.c.bf16 %v1564_v1, %v1563_v0 }
 0x4a5   : > { %2903 = vmatprep.subr.bf16.mxu0 %v3274_v59 }
 0x55a   : > { %v1273_v5 = vpop.f32.mrb[10].mxu0 }
 0x55b   : > { %v2657_v6 = vpop.f32.mrb[11].mxu0  ;;  %v1289_v8 = vrot.slane %v1273_v5, 7 }
 0x55c   : > { %v1548_v6 = vld [vmem:[%s4282_s9 + $0x58] sm:$0xff] }
 0x55e   : > { %v1278_v7 = vpop.f32.mrb[12].mxu0 }
 0x55f   : > { %v1290_v9 = vrot.slane %v1278_v7, 7  ;;  %v2660_v10 = vpop.f32.mrb[13].mxu0  ;;  %v1296_v13 = vrot.slane %v1278_v7, 6  ;;  %v1565_v7 = vld [vmem:[%s4282_s9 + $0xe0] sm:$0xff] }
 0x561   : > { %v1291_v11 = vsel %vm901_vm10, %v1289_v8, %v1290_v9  ;;  %v1566_v8 = vld [vmem:[%s4282_s9 + $0xe8] sm:$0xff] }
 0x562   : > { %1292 = vrot.lane.b32.xlu0 %v1291_v11, %s3272_s23  ;;  %v1283_v12 = vpop.f32.mrb[14].mxu0  ;;  %v2895_v10 = vpack.c.bf16 %v1566_v8, %v1565_v7  ;;  %v1549_v11 = vld [vmem:[%s4282_s9 + $0x60] sm:$0xff]  ;;  %v2322_v7 = vld [vmem:[#allocation6] ss:$0 sm:$0xff] }
 0x563   : > { %v1297_v14 = vrot.slane %v1283_v12, 6  ;;  %v2663_v15 = vpop.f32.mrb[15].mxu0  ;;  %v1550_v12 = vld [vmem:[%s4282_s9 + $0x68] sm:$0xff] }
 0x565   : > { %v1298_v16 = vsel %vm714_vm4, %v1296_v13, %v1297_v14  ;;  %v2897_v13 = vpack.c.bf16 %v1550_v12, %v1549_v11  ;;  %vm1756_vm4 = vcmask 56320  }
 0x566   : > { %1299 = vrot.lane.b32.xlu1 %v1298_v16, %s3273_s27 }
 0x5d4   : > { %v1293_v17 = vpop.permute.xlu0 %1292 }
 0x5d5   : > { %v1302_v20 = vsel %vm928_vm14, %v1273_v5, %v1293_v17  ;;  %v1547_v5 = vld [vmem:[%s4282_s9 + $0x50] sm:$0xff] }
 0x5d6   : > { %v2893_v9 = vpack.c.bf16 %v1548_v6, %v1547_v5 }
 0x5d8   : > { %v1300_v18 = vpop.permute.xlu1 %1299 }
 0x5d9   : > { %2685 = vmatmul.mubr.msk.f32.vlgmr.msra.gmra.mrb[4].mxu1 %vm983_vm12, %v1300_v18  ;;  %v1303_v19 = vsel %vm931_vm13, %v1293_v17, %v1300_v18  ;;  %v2320_v17 = vld [vmem:[#allocation4] ss:$0 sm:$0xff] }
 0x5da   : > { %1419 = vmatprep.mubr.f32.mxu0 %v1303_v19  ;;  %2874 = vmatpush3.bf16.msra.mxu1 %v2873_v28 }
 0x5db   : > { %1420 = vmatmul.mubr.f32.vlgmr.msra.gmra.mrb[16].mxu0 %v1302_v20  ;;  %2876 = vmatprep.subr.bf16.mxu1 %v2875_v29 }
 0x5dc   : > { %2707 = vmatprep.mubr.msk.f32.mxu0 %vm3275_vm15, %v3276_v60  ;;  %2905 = vmatpush3.bf16.msra.mxu0 %v2904_v41  ;;  %v1567_v41 = vld [vmem:[%s4282_s9 + $0xf0] sm:$0xff] }
 0x5dd   : > { %2906 = vmatprep.subr.bf16.mxu0 %v3274_v59  ;;  %v2899_v45 = vpack.c.bf16 %v1568_v42, %v1567_v41  ;;  %v1853_v42 = vld [vmem:[%s4285_s12 + $0x8] sm:$0xff] }
 0x5de   : > { %2878 = vmatpush3.bf16.msra.mxu1 %v2877_v35 }
 0x5df   : > { %2880 = vmatprep.subr.bf16.mxu1 %v2879_v38  ;;  %v1577_v38 = vld [vmem:[%s4282_s9 + $0x140] sm:$0xff] }
 0x5e0   : > { %2908 = vmatpush3.bf16.msra.mxu0 %v2907_v48  ;;  %v2916_v40 = vpack.c.bf16 %v1578_v39, %v1577_v38  ;;  %v1552_v48 = vld [vmem:[%s4282_s9 + $0x78] sm:$0xff]  ;;  %v1868_v38 = vld [vmem:[%s4285_s12 + $0x80] sm:$0xff]  ;;  %v1869_v39 = vld [vmem:[%s4285_s12 + $0x88] sm:$0xff] }
 0x5e1   : > { %2909 = vmatprep.subr.bf16.mxu0 %v3274_v59  ;;  %v2918_v41 = vpack.c.bf16 %v1869_v39, %v1868_v38 }
 0x5e2   : > { %2882 = vmatpush3.bf16.msra.mxu1 %v2881_v49  ;;  %v2901_v49 = vpack.c.bf16 %v1552_v48, %v1551_v47 }
 0x5e3   : > { %2884 = vmatprep.subr.bf16.mxu1 %v2883_v46 }
 0x5e4   : > { %2911 = vmatpush3.bf16.msra.mxu0 %v2910_v55 }
 0x5e5   : > { %2912 = vmatprep.subr.bf16.mxu0 %v3274_v59 }
 0x5e6   : > { %2886 = vmatpush3.bf16.msra.mxu1 %v2885_v56 }
 0x5e7   : > { %2888 = vmatprep.subr.bf16.mxu1 %v2887_v61 }
 0x5e8   : > { %2914 = vmatpush3.bf16.msra.mxu0 %v2913_v2 }
 0x5e9   : > { %2915 = vmatprep.subr.bf16.mxu0 %v3274_v59 }
 0x5ea   : > { %2890 = vmatpush3.bf16.msra.mxu1 %v2889_v3  ;;  %v1754_v3 = vld [vmem:[%s4284_s11] sm:$0xff] }
 0x5eb   : > { %2892 = vmatprep.subr.bf16.mxu1 %v2891_v4 }
 0x5ec   : > { %2917 = vmatpush3.bf16.msra.mxu0 %v2916_v40  ;;  %v1852_v40 = vld [vmem:[%s4285_s12] sm:$0xff] }
 0x5ed   : > { %v2920_v47 = vpack.c.bf16 %v1853_v42, %v1852_v40 }
 0x5ee   : > { %2894 = vmatpush3.bf16.msra.mxu1 %v2893_v9 }
 0x5ef   : > { %2896 = vmatprep.subr.bf16.mxu1 %v2895_v10 }
 0x5f2   : > { %2898 = vmatpush3.bf16.msra.mxu1 %v2897_v13 }
 0x5f3   : > { %2900 = vmatprep.subr.bf16.mxu1 %v2899_v45  ;;  %v1871_v45 = vld [vmem:[%s4285_s12 + $0x98] sm:$0xff] }
 0x5f6   : > { %2902 = vmatpush3.bf16.msra.mxu1 %v2901_v49  ;;  %v1854_v49 = vld [vmem:[%s4285_s12 + $0x10] sm:$0xff] }
 0x5f7   : > { %2950 = vmatprep.subr.bf16.mxu1 %v3274_v59 }
 0x6ac   : > { %v1491_v14 = vpop.f32.mrb[4].mxu1 }
 0x6ad   : > { %v2686_v15 = vpop.f32.mrb[5].mxu1 }
 0x6ae   : > { %v2442_v16 = vpop.f32.mrb[16].mxu0 }
 0x6af   : > { %v2443_v18 = vpop.f32.mrb[17].mxu0 }
 0x6b0   : > { %v2444_v19 = vadd.f32 %v2443_v18, %v2442_v16 }
 0x6b2   : > { %v1422_v20 = vadd.f32 %v2444_v19, %v2320_v17 }
 0x6b4   : > { %v1492_v21 = vadd.f32 %v1491_v14, %v1422_v20 }
 0x6b6   : > { %v1496_v22 = vmul.f32 0.70710677, %v1492_v21  ;;  %v1495_v54 = vmul.f32 0.5, %v1492_v21 }
 0x6b8   : > { %v1499_v23 = vand.u32 2147483647, %v1496_v22  ;;  %vm1497_vm2 = vcmp.ge.f32.partialorder %v1496_v22, 0.0 }
 0x6b9   : > { %v1498_v52 = vsel %vm1497_vm2, 1.0, %v3271_v31 }
 0x6ba   : > { %v1500_v24 = vmul.f32 0.3275911, %v1499_v23  ;;  %v1512_v26 = vsub.f32 0.0, %v1499_v23 }
 0x6bc   : > { %v1501_v25 = vadd.f32 1.0, %v1500_v24  ;;  %v1513_v28 = vmul.f32 %v1512_v26, %v1499_v23 }
 0x6be   : > { %3089 = vrcp.f32 %v1501_v25  ;;  %v1514_v32 = vmul.f32 1.442695, %v1513_v28 }
 0x6c0   : > { %3091 = vpow2.f32 %v1514_v32 }
 0x6c8   : > { %v3090_v27 = vpop.eup %3089 }
 0x6c9   : > { %v1503_v29 = vmul.f32 1.0614054, %v3090_v27 }
 0x6ca   : > { %v3092_v44 = vpop.eup %3091 }
 0x6cb   : > { %v1504_v30 = vadd.f32 -1.4531521, %v1503_v29 }
 0x6cd   : > { %v1505_v33 = vmul.f32 %v3090_v27, %v1504_v30 }
 0x6cf   : > { %v1506_v34 = vadd.f32 1.4214138, %v1505_v33 }
 0x6d1   : > { %v1507_v35 = vmul.f32 %v3090_v27, %v1506_v34 }
 0x6d3   : > { %v1508_v36 = vadd.f32 -0.28449672, %v1507_v35 }
 0x6d5   : > { %v1509_v37 = vmul.f32 %v3090_v27, %v1508_v36 }
 0x6d7   : > { %v1510_v43 = vadd.f32 0.2548296, %v1509_v37  ;;  %v1755_v37 = vld [vmem:[%s4284_s11 + $0x8] sm:$0xf] }
 0x6d9   : > { %v1511_v50 = vmul.f32 %v3090_v27, %v1510_v43  ;;  %v1870_v43 = vld [vmem:[%s4285_s12 + $0x90] sm:$0xff] }
 0x6da   : > { %v2922_v48 = vpack.c.bf16 %v1871_v45, %v1870_v43 }
 0x6db   : > { %v1516_v46 = vmul.f32 %v3092_v44, %v1511_v50  ;;  %v1855_v50 = vld [vmem:[%s4285_s12 + $0x18] sm:$0xff]  ;;  %v1872_v44 = vld [vmem:[%s4285_s12 + $0xa0] sm:$0xff] }
 0x6dd   : > { %v1517_v51 = vsub.f32 1.0, %v1516_v46  ;;  %v1873_v46 = vld [vmem:[%s4285_s12 + $0xa8] sm:$0xff] }
 0x6df   : > { %v1518_v53 = vmul.f32 %v1517_v51, %v1498_v52  ;;  %v2924_v51 = vpack.c.bf16 %v1855_v50, %v1854_v49  ;;  %v1884_v52 = vld [vmem:[%s4285_s12 + $0x100] sm:$0xff] }
 0x6e0   : > { %v2083_v49 = vld [vmem:[%s4310_s17] sm:$0xff] }
 0x6e1   : > { %v1519_v55 = vadd.f32 1.0, %v1518_v53  ;;  %v2926_v53 = vpack.c.bf16 %v1873_v46, %v1872_v44  ;;  %v2084_v44 = vld [vmem:[%s4310_s17 + $0x8] sm:$0xff]  ;;  %v2101_v46 = vld [vmem:[%s4310_s17 + $0x90] sm:$0xff] }
 0x6e3   : > { %v1520_v56 = vmul.f32 %v1519_v55, %v1495_v54  ;;  %v1856_v54 = vld [vmem:[%s4285_s12 + $0x20] sm:$0xff]  ;;  %v1857_v55 = vld [vmem:[%s4285_s12 + $0x28] sm:$0xff] }
 0x6e5   : > { %1528 = vrot.lane.b32.xlu0 %v1520_v56, %s3272_s23  ;;  %v1525_v57 = vrot.slane %v1520_v56, 1  ;;  %v1522_v61 = vrot.slane %v1520_v56, 7  ;;  %v1885_v56 = vld [vmem:[%s4285_s12 + $0x108] sm:$0xff] }
 0x6e7   : > { %v1527_v58 = vsel %vm1203_vm3, %v1525_v57, 0.0  ;;  %v1524_v0 = vsel %vm901_vm10, 0.0, %v1522_v61  ;;  %v1874_v57 = vld [vmem:[%s4285_s12 + $0xb0] sm:$0xff]  ;;  %v2951_v61 = vpack.c.bf16 %v1885_v56, %v1884_v52  ;;  %v2967_v52 = vpack.c.bf16 %v2084_v44, %v2083_v49  ;;  %v2103_v56 = vld [vmem:[%s4310_s17 + $0xa0] sm:$0xff] }
 0x6e8   : > { %1532 = vrot.lane.b32.xlu1 %v1527_v58, %s3273_s27  ;;  %v1875_v58 = vld [vmem:[%s4285_s12 + $0xb8] sm:$0xff]  ;;  %v2113_v44 = vld [vmem:[%s4310_s17 + $0xf0] sm:$0xff]  ;;  %vm2186_vm10 = vcmask 319488  }
 0x757   : > { %v1529_v62 = vpop.permute.xlu0 %1528 }
 0x758   : > { %v1535_v2 = vsel %vm928_vm14, %v1524_v0, %v1529_v62  ;;  %v2928_v0 = vpack.c.bf16 %v1857_v55, %v1856_v54  ;;  %v2085_v54 = vld [vmem:[%s4310_s17 + $0x10] sm:$0xff]  ;;  %v2086_v55 = vld [vmem:[%s4310_s17 + $0x18] sm:$0xff] }
 0x75a   : > { %v1533_v63 = vpop.permute.xlu1 %1532 }
 0x75b   : > { %2708 = vmatmul.mubr.msk.f32.vlgmr.msra.gmra.mrb[18].mxu0 %vm983_vm12, %v1533_v63  ;;  %v1536_v1 = vsel %vm931_vm13, %v1529_v62, %v1533_v63  ;;  %v1886_v62 = vld [vmem:[%s4285_s12 + $0x110] sm:$0xff]  ;;  %v1887_v63 = vld [vmem:[%s4285_s12 + $0x118] sm:$0xff] }
 0x75c   : > { %1652 = vmatprep.mubr.f32.mxu1 %v1536_v1  ;;  %2712 = vmatprep.mubr.msk.f32.mxu0 %vm1756_vm4, %v1754_v3  ;;  %v1858_v1 = vld [vmem:[%s4285_s12 + $0x30] sm:$0xff]  ;;  %v2930_v3 = vpack.c.bf16 %v1875_v58, %v1874_v57  ;;  %v2104_v57 = vld [vmem:[%s4310_s17 + $0xa8] sm:$0xff]  ;;  %v2971_v58 = vpack.c.bf16 %v2086_v55, %v2085_v54  ;;  %v2098_v54 = vld [vmem:[%s4310_s17 + $0x78] sm:$0xff] }
 0x75d   : > { %1653 = vmatmul.mubr.f32.vlgmr.msra.gmra.mrb[6].mxu1 %v1535_v2  ;;  %v2954_v2 = vpack.c.bf16 %v1887_v63, %v1886_v62  ;;  %v2087_v62 = vld [vmem:[%s4310_s17 + $0x20] sm:$0xff]  ;;  %v2088_v63 = vld [vmem:[%s4310_s17 + $0x28] sm:$0xff] }
 0x75e   : > { %2735 = vmatprep.mubr.msk.f32.mxu1 %vm3275_vm15, %v3276_v60  ;;  %2952 = vmatpush3.bf16.msra.mxu1 %v2951_v61  ;;  %v2973_v61 = vpack.c.bf16 %v2104_v57, %v2103_v56 }
 0x75f   : > { %2953 = vmatprep.subr.bf16.mxu1 %v3274_v59 }
 0x762   : > { %2955 = vmatpush3.bf16.msra.mxu1 %v2954_v2  ;;  %v2975_v2 = vpack.c.bf16 %v2088_v63, %v2087_v62 }
 0x763   : > { %2956 = vmatprep.subr.bf16.mxu1 %v3274_v59 }
 0x82e   : > { %v1724_v4 = vpop.f32.mrb[18].mxu0 }
 0x82f   : > { %v2709_v5 = vpop.f32.mrb[19].mxu0 }
 0x830   : > { %v2488_v6 = vpop.f32.mrb[6].mxu1  ;;  %v1888_v5 = vld [vmem:[%s4285_s12 + $0x120] sm:$0xff] }
 0x831   : > { %v2489_v8 = vpop.f32.mrb[7].mxu1 }
 0x832   : > { %v2490_v9 = vadd.f32 %v2489_v8, %v2488_v6  ;;  %v1889_v6 = vld [vmem:[%s4285_s12 + $0x128] sm:$0xff] }
 0x833   : > { %v1877_v8 = vld [vmem:[%s4285_s12 + $0xc8] sm:$0xff] }
 0x834   : > { %v1655_v10 = vadd.f32 %v2490_v9, %v2322_v7  ;;  %v1876_v7 = vld [vmem:[%s4285_s12 + $0xc0] sm:$0xff] }
 0x836   : > { %v1725_v11 = vadd.f32 %v1724_v4, %v1655_v10  ;;  %v1859_v4 = vld [vmem:[%s4285_s12 + $0x38] sm:$0xff]  ;;  %v1860_v10 = vld [vmem:[%s4285_s12 + $0x40] sm:$0xff] }
 0x837   : > { %v2932_v9 = vpack.c.bf16 %v1859_v4, %v1858_v1  ;;  %v2106_v1 = vld [vmem:[%s4310_s17 + $0xb8] sm:$0xff]  ;;  %v2089_v4 = vld [vmem:[%s4310_s17 + $0x30] sm:$0xff] }
 0x838   : > { %v1729_v12 = vmul.f32 0.70710677, %v1725_v11  ;;  %v1728_v34 = vmul.f32 0.5, %v1725_v11  ;;  %v2957_v11 = vpack.c.bf16 %v1889_v6, %v1888_v5  ;;  %v2090_v5 = vld [vmem:[%s4310_s17 + $0x38] sm:$0xff]  ;;  %v2107_v6 = vld [vmem:[%s4310_s17 + $0xc0] sm:$0xff] }
 0x83a   : > { %v1732_v13 = vand.u32 2147483647, %v1729_v12  ;;  %vm1730_vm7 = vcmp.ge.f32.partialorder %v1729_v12, 0.0  ;;  %v2934_v12 = vpack.c.bf16 %v1877_v8, %v1876_v7  ;;  %2958 = vmatpush3.bf16.msra.mxu1 %v2957_v11  ;;  %v2108_v7 = vld [vmem:[%s4310_s17 + $0xc8] sm:$0xff]  ;;  %v2979_v8 = vpack.c.bf16 %v2090_v5, %v2089_v4 }
 0x83b   : > { %v1731_v32 = vsel %vm1730_vm7, 1.0, %v3271_v31  ;;  %2959 = vmatprep.subr.bf16.mxu1 %v3274_v59  ;;  %v2092_v11 = vld [vmem:[%s4310_s17 + $0x48] sm:$0xff] }
 0x83c   : > { %v1733_v14 = vmul.f32 0.3275911, %v1732_v13  ;;  %v1745_v60 = vsub.f32 0.0, %v1732_v13 }
 0x83e   : > { %v1734_v15 = vadd.f32 1.0, %v1733_v14  ;;  %v1746_v17 = vmul.f32 %v1745_v60, %v1732_v13  ;;  %v1861_v13 = vld [vmem:[%s4285_s12 + $0x48] sm:$0xff]  ;;  %v1890_v14 = vld [vmem:[%s4285_s12 + $0x130] sm:$0xff] }
 0x83f   : > { %v1878_v60 = vld [vmem:[%s4285_s12 + $0xd0] sm:$0xff] }
 0x840   : > { %3093 = vrcp.f32 %v1734_v15  ;;  %v1747_v20 = vmul.f32 1.442695, %v1746_v17  ;;  %v1891_v15 = vld [vmem:[%s4285_s12 + $0x138] sm:$0xff]  ;;  %v2936_v17 = vpack.c.bf16 %v1861_v13, %v1860_v10  ;;  %v2091_v10 = vld [vmem:[%s4310_s17 + $0x40] sm:$0xff] }
 0x841   : > { %v2110_v13 = vld [vmem:[%s4310_s17 + $0xd8] sm:$0xff] }
 0x842   : > { %3095 = vpow2.f32 %v1747_v20 }
 0x84a   : > { %v3094_v16 = vpop.eup %3093 }
 0x84b   : > { %v1736_v18 = vmul.f32 1.0614054, %v3094_v16 }
 0x84c   : > { %v3096_v28 = vpop.eup %3095 }
 0x84d   : > { %v1737_v19 = vadd.f32 -1.4531521, %v1736_v18  ;;  %v1862_v18 = vld [vmem:[%s4285_s12 + $0x50] sm:$0xff] }
 0x84f   : > { %v1738_v21 = vmul.f32 %v3094_v16, %v1737_v19  ;;  %v2960_v19 = vpack.c.bf16 %v1891_v15, %v1890_v14  ;;  %v2983_v14 = vpack.c.bf16 %v2092_v11, %v2091_v10  ;;  %v2115_v10 = vld [vmem:[#allocation9] sm:$0x1] }
 0x851   : > { %v1739_v22 = vadd.f32 1.4214138, %v1738_v21  ;;  %v1863_v21 = vld [vmem:[%s4285_s12 + $0x58] sm:$0xff]  ;;  %2961 = vmatpush3.bf16.msra.mxu1 %v2960_v19 }
 0x852   : > { %2962 = vmatprep.subr.bf16.mxu1 %v3274_v59  ;;  %v1867_v59 = vld [vmem:[%s4285_s12 + $0x78] sm:$0xff] }
 0x853   : > { %v1740_v23 = vmul.f32 %v3094_v16, %v1739_v22  ;;  %v1892_v22 = vld [vmem:[%s4285_s12 + $0x140] sm:$0xff] }
 0x855   : > { %v1741_v24 = vadd.f32 -0.28449672, %v1740_v23  ;;  %v1893_v23 = vld [vmem:[%s4285_s12 + $0x148] sm:$0xff] }
 0x857   : > { %v1742_v25 = vmul.f32 %v3094_v16, %v1741_v24  ;;  %v1880_v24 = vld [vmem:[%s4285_s12 + $0xe0] sm:$0xff] }
 0x859   : > { %v1743_v26 = vadd.f32 0.2548296, %v1742_v25  ;;  %v1881_v25 = vld [vmem:[%s4285_s12 + $0xe8] sm:$0xff] }
 0x85b   : > { %v1744_v27 = vmul.f32 %v3094_v16, %v1743_v26  ;;  %v1879_v16 = vld [vmem:[%s4285_s12 + $0xd8] sm:$0xff]  ;;  %v2940_v26 = vpack.c.bf16 %v1863_v21, %v1862_v18  ;;  %v2112_v18 = vld [vmem:[%s4310_s17 + $0xe8] sm:$0xff]  ;;  %v2095_v21 = vld [vmem:[%s4310_s17 + $0x60] sm:$0xff] }
 0x85c   : > { %v2938_v20 = vpack.c.bf16 %v1879_v16, %v1878_v60  ;;  %v2093_v60 = vld [vmem:[%s4310_s17 + $0x50] sm:$0xff]  ;;  %v2094_v16 = vld [vmem:[%s4310_s17 + $0x58] sm:$0xff] }
 0x85d   : > { %v1749_v29 = vmul.f32 %v3096_v28, %v1744_v27  ;;  %v2963_v27 = vpack.c.bf16 %v1893_v23, %v1892_v22  ;;  %v2942_v28 = vpack.c.bf16 %v1881_v25, %v1880_v24  ;;  %v2987_v19 = vpack.c.bf16 %v2094_v16, %v2093_v60  ;;  %v2096_v22 = vld [vmem:[%s4310_s17 + $0x68] sm:$0xff] }
 0x85e   : > { %v2991_v23 = vpack.c.bf16 %v2096_v22, %v2095_v21 }
 0x85f   : > { %v1750_v30 = vsub.f32 1.0, %v1749_v29  ;;  %v1864_v29 = vld [vmem:[%s4285_s12 + $0x60] sm:$0xff]  ;;  %2964 = vmatpush3.bf16.msra.mxu1 %v2963_v27  ;;  %v2327_v27 = vld [vmem:[#allocation7] ss:$0 sm:$0xff] }
 0x861   : > { %v1751_v33 = vmul.f32 %v1750_v30, %v1731_v32  ;;  %v1865_v30 = vld [vmem:[%s4285_s12 + $0x68] sm:$0xff]  ;;  %v1882_v32 = vld [vmem:[%s4285_s12 + $0xf0] sm:$0xff] }
 0x863   : > { %v1752_v35 = vadd.f32 1.0, %v1751_v33  ;;  %v1883_v33 = vld [vmem:[%s4285_s12 + $0xf8] sm:$0xff] }
 0x865   : > { %v1753_v36 = vmul.f32 %v1752_v35, %v1728_v34  ;;  %v2944_v34 = vpack.c.bf16 %v1865_v30, %v1864_v29  ;;  %v2946_v35 = vpack.c.bf16 %v1883_v33, %v1882_v32 }
 0x867   : > { %2710 = vmatprep.subr.msk.mxu0 %vm908_vm9, %v1753_v36 }
 0x868   : > { %2711 = vmatpush3.msk.msra.mxu0 %vm908_vm9, %v1753_v36  ;;  %v1866_v36 = vld [vmem:[%s4285_s12 + $0x70] sm:$0xff]  ;;  %vm2080_vm9 = vcmask 523264  }
 0x869   : > { %2713 = vmatmul.mubr.msk.f32.vlgmr.msra.gmra.mrb[20].mxu0 %vm1756_vm4, %v1755_v37  ;;  %2919 = vmatprep.subr.bf16.mxu0 %v2918_v41  ;;  %v2948_v37 = vpack.c.bf16 %v1867_v59, %v1866_v36 }
 0x86a   : > { %2921 = vmatpush3.bf16.msra.mxu0 %v2920_v47  ;;  %v2099_v47 = vld [vmem:[%s4309_s21 + $0x80] sm:$0xff] }
 0x86b   : > { %2923 = vmatprep.subr.bf16.mxu0 %v2922_v48  ;;  %v2100_v48 = vld [vmem:[%s4310_s17 + $0x88] sm:$0xff] }
 0x86c   : > { %v2965_v50 = vpack.c.bf16 %v2100_v48, %v2099_v47 }
 0x86e   : > { %2925 = vmatpush3.bf16.msra.mxu0 %v2924_v51  ;;  %v2102_v51 = vld [vmem:[%s4310_s17 + $0x98] sm:$0xff]  ;;  %2966 = vmatprep.subr.bf16.mxu1 %v2965_v50 }
 0x86f   : > { %2927 = vmatprep.subr.bf16.mxu0 %v2926_v53  ;;  %v2969_v53 = vpack.c.bf16 %v2102_v51, %v2101_v46  ;;  %v2114_v46 = vld [vmem:[%s4310_s17 + $0xf8] sm:$0xff] }
 0x872   : > { %2929 = vmatpush3.bf16.msra.mxu0 %v2928_v0  ;;  %v2105_v0 = vld [vmem:[%s4310_s17 + $0xb0] sm:$0xff] }
 0x873   : > { %2931 = vmatprep.subr.bf16.mxu0 %v2930_v3  ;;  %v2977_v3 = vpack.c.bf16 %v2106_v1, %v2105_v0 }
 0x876   : > { %2933 = vmatpush3.bf16.msra.mxu0 %v2932_v9  ;;  %v2981_v9 = vpack.c.bf16 %v2108_v7, %v2107_v6 }
 0x877   : > { %2935 = vmatprep.subr.bf16.mxu0 %v2934_v12  ;;  %v2109_v12 = vld [vmem:[%s4310_s17 + $0xd0] sm:$0xff] }
 0x878   : > { %v2985_v15 = vpack.c.bf16 %v2110_v13, %v2109_v12 }
 0x87a   : > { %2937 = vmatpush3.bf16.msra.mxu0 %v2936_v17  ;;  %v2111_v17 = vld [vmem:[%s4310_s17 + $0xe0] sm:$0xff] }
 0x87b   : > { %2939 = vmatprep.subr.bf16.mxu0 %v2938_v20  ;;  %v2989_v20 = vpack.c.bf16 %v2112_v18, %v2111_v17 }
 0x87e   : > { %2941 = vmatpush3.bf16.msra.mxu0 %v2940_v26 }
 0x87f   : > { %2943 = vmatprep.subr.bf16.mxu0 %v2942_v28 }
 0x882   : > { %2945 = vmatpush3.bf16.msra.mxu0 %v2944_v34 }
 0x883   : > { %2947 = vmatprep.subr.bf16.mxu0 %v2946_v35 }
 0x886   : > { %2949 = vmatpush3.bf16.msra.mxu0 %v2948_v37 }
 0x93c   : > { %v2714_v38 = vpop.f32.mrb[20].mxu0 }
 0x93d   : > { %v1832_v39 = vpop.f32.mrb[21].mxu0  ;;  %1847 = vrot.lane.b32.xlu1 %v2714_v38, %s3273_s27  ;;  %s3277_s27 = smov 64  }
 0x93e   : > { %v1842_v40 = vrot.slane %v1832_v39, 4 }
 0x940   : > { %1843 = vrot.lane.b32.xlu0 %v1842_v40, %s3272_s23 }
 0x9af   : > { %v1848_v41 = vpop.permute.xlu1 %1847 }
 0x9b0   : > { %2736 = vmatmul.mubr.msk.f32.vlgmr.msra.gmra.mrb[8].mxu1 %vm983_vm12, %v1848_v41 }
 0x9b1   : > { %2968 = vmatpush3.bf16.msra.mxu1 %v2967_v52  ;;  %v2993_v52 = vpack.c.bf16 %v2114_v46, %v2113_v44 }
 0x9b2   : > { %v1844_v42 = vpop.permute.xlu0 %1843  ;;  %2970 = vmatprep.subr.bf16.mxu1 %v2969_v53  ;;  %v2097_v53 = vld [vmem:[%s4310_s17 + $0x70] sm:$0xff] }
 0x9b3   : > { %v1850_v43 = vsel %vm928_vm14, %v1832_v39, %v1844_v42  ;;  %v1851_v45 = vsel %vm931_vm13, %v1844_v42, %v1848_v41  ;;  %v2995_v56 = vpack.c.bf16 %v2098_v54, %v2097_v53 }
 0x9b4   : > { %1967 = vmatprep.mubr.f32.mxu0 %v1851_v45 }
 0x9b5   : > { %1968 = vmatmul.mubr.f32.vlgmr.msra.gmra.mrb[22].mxu0 %v1850_v43  ;;  %2972 = vmatpush3.bf16.msra.mxu1 %v2971_v58 }
 0x9b6   : > { %2974 = vmatprep.subr.bf16.mxu1 %v2973_v61 }
 0x9b9   : > { %2976 = vmatpush3.bf16.msra.mxu1 %v2975_v2 }
 0x9ba   : > { %2978 = vmatprep.subr.bf16.mxu1 %v2977_v3 }
 0x9bd   : > { %2980 = vmatpush3.bf16.msra.mxu1 %v2979_v8 }
 0x9be   : > { %2982 = vmatprep.subr.bf16.mxu1 %v2981_v9 }
 0x9c1   : > { %2984 = vmatpush3.bf16.msra.mxu1 %v2983_v14 }
 0x9c2   : > { %2986 = vmatprep.subr.bf16.mxu1 %v2985_v15 }
 0x9c5   : > { %2988 = vmatpush3.bf16.msra.mxu1 %v2987_v19 }
 0x9c6   : > { %2990 = vmatprep.subr.bf16.mxu1 %v2989_v20 }
 0x9c9   : > { %2992 = vmatpush3.bf16.msra.mxu1 %v2991_v23 }
 0x9ca   : > { %2994 = vmatprep.subr.bf16.mxu1 %v2993_v52 }
 0x9cd   : > { %2996 = vmatpush3.bf16.msra.mxu1 %v2995_v56 }
 0xa83   : > { %v2039_v24 = vpop.f32.mrb[8].mxu1 }
 0xa84   : > { %v2737_v25 = vpop.f32.mrb[9].mxu1 }
 0xa88   : > { %v2537_v26 = vpop.f32.mrb[22].mxu0 }
 0xa89   : > { %v2538_v28 = vpop.f32.mrb[23].mxu0 }
 0xa8a   : > { %v2539_v29 = vadd.f32 %v2538_v28, %v2537_v26 }
 0xa8c   : > { %v1970_v30 = vadd.f32 %v2539_v29, %v2327_v27 }
 0xa8e   : > { %v2040_v32 = vadd.f32 %v2039_v24, %v1970_v30 }
 0xa90   : > { %v2044_v33 = vmul.f32 0.70710677, %v2040_v32  ;;  %v2043_v62 = vmul.f32 0.5, %v2040_v32 }
 0xa92   : > { %v2047_v34 = vand.u32 2147483647, %v2044_v33  ;;  %vm2045_vm8 = vcmp.ge.f32.partialorder %v2044_v33, 0.0 }
 0xa93   : > { %v2046_v58 = vsel %vm2045_vm8, 1.0, %v3271_v31 }
 0xa94   : > { %v2048_v35 = vmul.f32 0.3275911, %v2047_v34  ;;  %v2060_v59 = vsub.f32 0.0, %v2047_v34 }
 0xa96   : > { %v2049_v36 = vadd.f32 1.0, %v2048_v35  ;;  %v2061_v38 = vmul.f32 %v2060_v59, %v2047_v34 }
 0xa98   : > { %3097 = vrcp.f32 %v2049_v36  ;;  %v2062_v41 = vmul.f32 1.442695, %v2061_v38 }
 0xa9a   : > { %3099 = vpow2.f32 %v2062_v41 }
 0xaa2   : > { %v3098_v37 = vpop.eup %3097 }
 0xaa3   : > { %v2051_v39 = vmul.f32 1.0614054, %v3098_v37 }
 0xaa4   : > { %v3100_v51 = vpop.eup %3099 }
 0xaa5   : > { %v2052_v40 = vadd.f32 -1.4531521, %v2051_v39 }
 0xaa7   : > { %v2053_v42 = vmul.f32 %v3098_v37, %v2052_v40 }
 0xaa9   : > { %v2054_v43 = vadd.f32 1.4214138, %v2053_v42 }
 0xaab   : > { %v2055_v45 = vmul.f32 %v3098_v37, %v2054_v43 }
 0xaad   : > { %v2056_v47 = vadd.f32 -0.28449672, %v2055_v45 }
 0xaaf   : > { %v2057_v48 = vmul.f32 %v3098_v37, %v2056_v47 }
 0xab1   : > { %v2058_v49 = vadd.f32 0.2548296, %v2057_v48 }
 0xab3   : > { %v2059_v50 = vmul.f32 %v3098_v37, %v2058_v49 }
 0xab5   : > { %v2064_v55 = vmul.f32 %v3100_v51, %v2059_v50 }
 0xab7   : > { %v2065_v57 = vsub.f32 1.0, %v2064_v55 }
 0xab9   : > { %v2066_v61 = vmul.f32 %v2065_v57, %v2046_v58 }
 0xabb   : > { %v2067_v63 = vadd.f32 1.0, %v2066_v61 }
 0xabd   : > { %v2068_v0 = vmul.f32 %v2067_v63, %v2043_v62 }
 0xabf   : > { %v2070_v1 = vrot.slane %v2068_v0, 1  ;;  %v2076_v2 = vrot.slane %v2068_v0, 3  ;;  %v2074_v7 = vrot.slane %v2068_v0, 2 }
 0xac1   : > { %v3068_v3 = vpack.i.bf16 %v2070_v1, %v2076_v2 }
 0xac3   : > { %3069 = vrot.lane.b32.xlu0 %v3068_v3, %s3277_s27 }
 0xb35   : > { %v3070_v4 = vpop.permute.xlu0 %3069 }
 0xb36   : > { %v3072_v5 = vunpack.i.h.bf16 %v3070_v4  ;;  %v3071_v6 = vunpack.i.l.bf16 %v3070_v4 }
 0xb38   : > { %v2082_v8 = vsel %vm2080_vm9, %v2074_v7, %v3071_v6  ;;  %v2081_v9 = vsel %vm2080_vm9, %v2068_v0, %v3072_v5 }
 0xb39   : > { %2180 = vmatprep.mubr.f32.mxu1 %v2082_v8 }
 0xb3a   : > { %2181 = vmatmul.mubr.f32.vlgmr.msra.gmra.mrb[10].mxu1 %v2081_v9 }
 0xc0d   : > { %v2583_v31 = vpop.f32.mrb[10].mxu1 }
 0xc0e   : > { %v2584_v11 = vpop.f32.mrb[11].mxu1 }
 0xc0f   : > { %v2585_v12 = vadd.f32 %v2584_v11, %v2583_v31 }
 0xc11   : > { %v2183_v13 = vadd.f32 %v2585_v12, %v2115_v10 }
 0xc13   : > { %2187 = vst.msk [vmem:[%s582_s30] sm:$0x1] %vm2186_vm10, %v2183_v13 }
 0xc14 PF: > { %s4312_s28 = sld [smem:[#allocation13_spill]] }
 0xc1a   : > { %s29_s21 = sadd.s32 1, %s4312_s28  }
 0xc1b   : > { %p26_p6 = scmp.ge.s32.totalorder %s29_s21, 4  }
 0xc1d   :  { %28 = sbr.rel (!%p26_p6) target bundleno = 7 (0x7), region = 135 }
 0xc24   :  { %2205 = vsyncpa [#allocation3], 1 }
 0xc25   :  { %2207 = vsyncpa [#allocation3 + $0x1], 1 }
 0xc26   :  { %2208 = vsyncpa [#allocation5], 1 }
 0xc27   :  { %2209 = vsyncpa [#allocation8], 1 }

</bundles_post_ra>
